<compile_context>
chip_gen: v5e
topology: v5e:2x2
jax: 0.10.0
libtpu: 0.0.40
codegen_flags: <defaults>
</compile_context>

<pallas_src>
import jax
import jax.numpy as jnp
from jax.experimental import pallas as pl
from jax.experimental.pallas import tpu as pltpu


LANE = 128     # TPU lane width
SUBLANE = 8    # f32 sublane height


def _round_up(x, m):
    return ((x + m - 1) // m) * m


# ----------------------------- Pallas kernel ------------------------------

def interaction_kernel(ids_ref, table_ref, o_ref):
    """Fused embedding gather + FM-style interaction for one batch tile.

    ids_ref   : (F, TB)          int32  field ids, batch on lanes
    table_ref : (Dpad + 8, Vpad) bf16   stacked LHS table:
                   rows [0, D)        : main embedding table, transposed
                   rows [D, Dpad)     : zero padding (Dpad = round_up(D, 8))
                   row   Dpad         : r[v] = sum_d ti*tg - 0.5 * sum_d t^2
                   rows (Dpad, Dpad+8): zero padding
    o_ref     : (1, TB)          f32    sigmoid(logit), lane-dense store
    """
    F, _ = ids_ref.shape
    R, V = table_ref.shape
    dpad = R - SUBLANE
    TB = ids_ref.shape[1]

    ids = ids_ref[...]                                              # (F, TB)
    vio = jax.lax.broadcasted_iota(jnp.int32, (V, TB), 0)           # (V, TB)

    # Count matrix C^T[v, b]: number of fields of sample b hitting vocab row v.
    # Accumulate as int32 (bool adds), cast to bf16 ONCE (counts <= F, exact).
    ct = (vio == ids[0:1, :]).astype(jnp.int32)
    for f in range(1, F):                                           # F is small & static
        ct = ct + (vio == ids[f:f + 1, :]).astype(jnp.int32)
    ct = ct.astype(jnp.bfloat16)                                    # (V, TB)

    # One bf16 x bf16 -> f32 MXU matmul gives everything:
    #   rows [0, dpad) : s[d, b] = sum_f E[b, f, d]   (padded rows are zero)
    #   rows [dpad, R) : only row dpad non-zero = sum_f r[ids[b, f]]
    prod = jnp.dot(table_ref[...], ct, preferred_element_type=jnp.float32)

    s = prod[:dpad, :]                                              # (dpad, TB)
    lin = prod[dpad:, :]                                            # (8, TB)

    # Reductions run over sublanes (axis 0); result is one scalar per lane.
    fm = 0.5 * jnp.sum(s * s, axis=0, keepdims=True)                # (1, TB)
    o_ref[...] = jax.nn.sigmoid(fm + jnp.sum(lin, axis=0, keepdims=True))


def feature_interaction(ids_fb, table, *, batch_tile=512):
    """ids_fb: (F, B) int32; table: (Dpad+8, Vpad) bf16 stacked table -> (B, 1) f32.

    batch_tile must be a multiple of 128; sweep 512-2048 for production batches
    (larger on v6e, smaller on v5e/v7x; on v7x pick it so B_pad / batch_tile is
    even so megacore gets both TensorCores busy).
    """
    F, B = ids_fb.shape
    R, V = table.shape

    tb = batch_tile
    assert tb % LANE == 0, "batch_tile must be a multiple of 128"
    b_pad = _round_up(max(B, tb), tb)
    if b_pad != B:
        # Pad ids with 0 (a valid row); padded batch lanes are sliced off below.
        ids_fb = jnp.pad(ids_fb, ((0, 0), (0, b_pad - B)))
    nblk = b_pad // tb

    # Derived VMEM budget: resident table (2 pipeline buffers) + double-buffered
    # ids/out blocks + per-tile intermediates (int32 + bf16 count matrix, f32
    # matmul result), with 2x headroom; floor 16 MiB, cap 48 MiB (v7x-safe).
    table_bytes = 2 * (R * V * 2)
    io_bytes = 2 * (F * tb * 4 + tb * 4)
    tmp_bytes = V * tb * (4 + 2) + R * tb * 4
    vmem_limit = int(min(48 * 1024 * 1024,
                         max(16 * 1024 * 1024,
                             2 * (table_bytes + io_bytes + tmp_bytes))))

    out = pl.pallas_call(
        interaction_kernel,
        out_shape=jax.ShapeDtypeStruct((nblk, tb), jnp.float32),
        grid=(nblk,),
        in_specs=[
            pl.BlockSpec((F, tb), lambda b: (0, b)),   # ids: batch tile on lanes
            # Table block index is constant -> resident across grid steps.
            pl.BlockSpec((R, V), lambda b: (0, 0)),
        ],
        out_specs=pl.BlockSpec((1, tb), lambda b: (b, 0)),  # lane-dense output
        compiler_params=pltpu.CompilerParams(
            dimension_semantics=("parallel",),
            vmem_limit_bytes=vmem_limit,
        ),
    )(ids_fb, table)

    return out.reshape(b_pad)[:B].reshape(B, 1)


# ------------------------------ Model glue --------------------------------

class BasicModelPallas:
    """JAX/Pallas port of BasicModel with an FM-style FeatureInteraction."""

    def __init__(self, vocab_size, num_fields, embed_dim, key, *, batch_tile=512):
        k0, k1, k2 = jax.random.split(key, 3)
        scale = 0.1
        # f32 "parameters"; the kernel consumes a single bf16, vocab-padded,
        # transposed, row-stacked copy prepared once here.
        self.emb_table = scale * jax.random.normal(
            k0, (vocab_size, embed_dim), jnp.float32)
        self.i_emb_table = scale * jax.random.normal(
            k1, (vocab_size, embed_dim), jnp.float32)
        self.g_emb_table = scale * jax.random.normal(
            k2, (vocab_size, embed_dim), jnp.float32)
        self.vocab_size = vocab_size
        self.num_fields = num_fields
        self.embed_dim = embed_dim
        self.batch_tile = batch_tile
        self.backbone = []   # matches BasicModel.__init__ (empty list)

        # ---- one-time table prep: the algebraic fold ----
        vpad = _round_up(vocab_size, LANE)
        dpad = _round_up(embed_dim, SUBLANE)
        u = jnp.sum(self.emb_table * self.emb_table, axis=1)         # (V,)
        w = jnp.sum(self.i_emb_table * self.g_emb_table, axis=1)     # (V,)
        r = w - 0.5 * u                                              # (V,)
        stacked = jnp.zeros((dpad + SUBLANE, vpad), jnp.float32)
        stacked = stacked.at[:embed_dim, :vocab_size].set(self.emb_table.T)
        stacked = stacked.at[dpad, :vocab_size].set(r)
        self._table = stacked.astype(jnp.bfloat16)                   # (Dpad+8, Vpad)
        self._dpad = dpad

    def __call__(self, sparse_input, dense_input=None):
        # forward():
        #   dense_input = embedding_layer(sparse_input)
        #   predict = FeatureInteraction(dense_input, sparse_input,
        #                                i_embedding_layer(sparse_input, 'no_id'),
        #                                g_embedding_layer(sparse_input))
        # All three gathers + the interaction are fused inside the Pallas kernel.
        ids_fb = jnp.transpose(sparse_input.astype(jnp.int32))       # (F, B)
        # TODO(synk): FeatureInteraction is abstract in BasicModel; the FM
        # second-order interaction + i/g cross term + sigmoid is the concrete
        # realization implemented here.
        # TODO(synk): the 'no_id' mode of i_Embedding is treated as a plain
        # id-based lookup of the same sparse ids.
        return feature_interaction(ids_fb, self._table, batch_tile=self.batch_tile)

    def regular_loss(self, weight):
        # Faithful to BasicModel.RegularLoss: iterates self.backbone (empty).
        if weight == 0:
            return 0.0
        loss = 0.0
        for name in self.backbone:
            p = getattr(self, name)
            loss = loss + jnp.linalg.norm(jnp.reshape(p, (-1,)), ord=2)
        return loss * weight


# ----------------------- pure-JAX references (check) ------------------------

def _reference_fused(model, sparse_input):
    """Kernel-faithful reference: same fused math on the prepared bf16 table."""
    tbl = model._table.astype(jnp.float32)                    # (Dpad+8, Vpad)
    D = model.embed_dim
    e = jnp.take(tbl[:D], sparse_input, axis=1)                # (D, B, F)
    s = jnp.sum(e, axis=2)                                     # (D, B)
    fm = 0.5 * jnp.sum(s * s, axis=0)                          # (B,)
    lin = jnp.sum(jnp.take(tbl[model._dpad], sparse_input, axis=0), axis=1)  # (B,)
    return jax.nn.sigmoid(fm + lin)[:, None]


def _reference_f32(model, sparse_input):
    """Semantic reference from the f32 parameters (FM + i/g cross + sigmoid)."""
    e = jnp.take(model.emb_table, sparse_input, axis=0)        # (B, F, D)
    ie = jnp.take(model.i_emb_table, sparse_input, axis=0)
    ge = jnp.take(model.g_emb_table, sparse_input, axis=0)
    s = jnp.sum(e, axis=1)                                     # (B, D)
    fm = 0.5 * jnp.sum(s * s - jnp.sum(e * e, axis=1),
                       axis=-1, keepdims=True)                 # (B, 1)
    cross = jnp.sum(ie * ge, axis=(1, 2))[:, None]             # (B, 1)
    return jax.nn.sigmoid(fm + cross)


# --------------------------------- main -----------------------------------

if __name__ == "__main__":
    key = jax.random.PRNGKey(0)
    k_params, k_ids = jax.random.split(key)

    VOCAB = 100
    B, F, D = 8, 8, 32

    model = BasicModelPallas(VOCAB, F, D, k_params)
    sparse_input = jax.random.randint(k_ids, (B, F), 0, VOCAB, dtype=jnp.int32)

    predict = model(sparse_input)
    jax.block_until_ready(predict)

    assert predict.shape == (B, 1)
    assert predict.dtype == jnp.float32
    assert bool(jnp.all(jnp.isfinite(predict)))

    ref_fused = _reference_fused(model, sparse_input)
    assert bool(jnp.allclose(predict, ref_fused, atol=1e-3, rtol=1e-3)), (
        float(jnp.max(jnp.abs(predict - ref_fused))))

    ref_f32 = _reference_f32(model, sparse_input)
    assert bool(jnp.allclose(predict, ref_f32, atol=2e-2, rtol=2e-2)), (
        float(jnp.max(jnp.abs(predict - ref_f32))))

    print("KERNEL_OK")
</pallas_src>

<mosaic_0001>
module attributes {stable_mosaic.version = 11 : i64} {
  func.func @interaction_kernel(%arg0: i32, %arg1: memref<8x512xi32, #tpu.memory_space<vmem>>, %arg2: memref<40x128xbf16, #tpu.memory_space<vmem>>, %arg3: memref<1x512xf32, #tpu.memory_space<vmem>>) attributes {dimension_semantics = [#tpu.dimension_semantics<parallel>], iteration_bounds = array<i64: 1>, scalar_prefetch = 0 : i64, scratch_operands = 0 : i64, tpu.core_type = #tpu.core_type<tc>, window_params = [{transform_indices = @transform_0, window_bounds = array<i64: 8, 512>}, {pipeline_mode = #tpu.pipeline_mode<synchronous>, transform_indices = @transform_1, window_bounds = array<i64: 40, 128>}, {transform_indices = @transform_2, window_bounds = array<i64: 1, 512>}]} {
    %c0 = arith.constant 0 : index
    %c0_0 = arith.constant 0 : index
    %0 = vector.load %arg1[%c0, %c0_0] : memref<8x512xi32, #tpu.memory_space<vmem>>, vector<8x512xi32>
    %1 = tpu.iota {dimensions = array<i32: 0>} : vector<128x512xi32>
    %2 = vector.extract_strided_slice %0 {offsets = [0, 0], sizes = [1, 512], strides = [1, 1]} : vector<8x512xi32> to vector<1x512xi32>
    %3 = vector.broadcast %2 : vector<1x512xi32> to vector<128x512xi32>
    %4 = arith.cmpi eq, %1, %3 : vector<128x512xi32>
    %5 = arith.extui %4 : vector<128x512xi1> to vector<128x512xi32>
    %6 = vector.extract_strided_slice %0 {offsets = [1, 0], sizes = [1, 512], strides = [1, 1]} : vector<8x512xi32> to vector<1x512xi32>
    %7 = vector.broadcast %6 : vector<1x512xi32> to vector<128x512xi32>
    %8 = arith.cmpi eq, %1, %7 : vector<128x512xi32>
    %9 = arith.extui %8 : vector<128x512xi1> to vector<128x512xi32>
    %10 = arith.addi %5, %9 : vector<128x512xi32>
    %11 = vector.extract_strided_slice %0 {offsets = [2, 0], sizes = [1, 512], strides = [1, 1]} : vector<8x512xi32> to vector<1x512xi32>
    %12 = vector.broadcast %11 : vector<1x512xi32> to vector<128x512xi32>
    %13 = arith.cmpi eq, %1, %12 : vector<128x512xi32>
    %14 = arith.extui %13 : vector<128x512xi1> to vector<128x512xi32>
    %15 = arith.addi %10, %14 : vector<128x512xi32>
    %16 = vector.extract_strided_slice %0 {offsets = [3, 0], sizes = [1, 512], strides = [1, 1]} : vector<8x512xi32> to vector<1x512xi32>
    %17 = vector.broadcast %16 : vector<1x512xi32> to vector<128x512xi32>
    %18 = arith.cmpi eq, %1, %17 : vector<128x512xi32>
    %19 = arith.extui %18 : vector<128x512xi1> to vector<128x512xi32>
    %20 = arith.addi %15, %19 : vector<128x512xi32>
    %21 = vector.extract_strided_slice %0 {offsets = [4, 0], sizes = [1, 512], strides = [1, 1]} : vector<8x512xi32> to vector<1x512xi32>
    %22 = vector.broadcast %21 : vector<1x512xi32> to vector<128x512xi32>
    %23 = arith.cmpi eq, %1, %22 : vector<128x512xi32>
    %24 = arith.extui %23 : vector<128x512xi1> to vector<128x512xi32>
    %25 = arith.addi %20, %24 : vector<128x512xi32>
    %26 = vector.extract_strided_slice %0 {offsets = [5, 0], sizes = [1, 512], strides = [1, 1]} : vector<8x512xi32> to vector<1x512xi32>
    %27 = vector.broadcast %26 : vector<1x512xi32> to vector<128x512xi32>
    %28 = arith.cmpi eq, %1, %27 : vector<128x512xi32>
    %29 = arith.extui %28 : vector<128x512xi1> to vector<128x512xi32>
    %30 = arith.addi %25, %29 : vector<128x512xi32>
    %31 = vector.extract_strided_slice %0 {offsets = [6, 0], sizes = [1, 512], strides = [1, 1]} : vector<8x512xi32> to vector<1x512xi32>
    %32 = vector.broadcast %31 : vector<1x512xi32> to vector<128x512xi32>
    %33 = arith.cmpi eq, %1, %32 : vector<128x512xi32>
    %34 = arith.extui %33 : vector<128x512xi1> to vector<128x512xi32>
    %35 = arith.addi %30, %34 : vector<128x512xi32>
    %36 = vector.extract_strided_slice %0 {offsets = [7, 0], sizes = [1, 512], strides = [1, 1]} : vector<8x512xi32> to vector<1x512xi32>
    %37 = vector.broadcast %36 : vector<1x512xi32> to vector<128x512xi32>
    %38 = arith.cmpi eq, %1, %37 : vector<128x512xi32>
    %39 = arith.extui %38 : vector<128x512xi1> to vector<128x512xi32>
    %40 = arith.addi %35, %39 : vector<128x512xi32>
    %41 = arith.sitofp %40 : vector<128x512xi32> to vector<128x512xbf16>
    %c0_1 = arith.constant 0 : index
    %c0_2 = arith.constant 0 : index
    %42 = vector.load %arg2[%c0_1, %c0_2] : memref<40x128xbf16, #tpu.memory_space<vmem>>, vector<40x128xbf16>
    %cst = arith.constant dense<0.000000e+00> : vector<40x512xf32>
    %43 = tpu.matmul %42, %41, %cst {dimension_numbers = #tpu.dot_dimension_numbers<[1], [0], [0], [1], [0, 0, 1, 1], [], []>} : vector<40x128xbf16>, vector<128x512xbf16>, vector<40x512xf32> -> vector<40x512xf32>
    %44 = vector.extract_strided_slice %43 {offsets = [0, 0], sizes = [32, 512], strides = [1, 1]} : vector<40x512xf32> to vector<32x512xf32>
    %45 = vector.extract_strided_slice %43 {offsets = [32, 0], sizes = [8, 512], strides = [1, 1]} : vector<40x512xf32> to vector<8x512xf32>
    %46 = arith.mulf %44, %44 : vector<32x512xf32>
    %cst_3 = arith.constant dense<0.000000e+00> : vector<512xf32>
    %47 = vector.multi_reduction <add>, %46, %cst_3 [0] : vector<32x512xf32> to vector<512xf32>
    %48 = vector.shape_cast %47 : vector<512xf32> to vector<1x512xf32>
    %cst_4 = arith.constant 5.000000e-01 : f32
    %49 = vector.broadcast %cst_4 : f32 to vector<1x512xf32>
    %50 = arith.mulf %49, %48 : vector<1x512xf32>
    %cst_5 = arith.constant dense<0.000000e+00> : vector<512xf32>
    %51 = vector.multi_reduction <add>, %45, %cst_5 [0] : vector<8x512xf32> to vector<512xf32>
    %52 = vector.shape_cast %51 : vector<512xf32> to vector<1x512xf32>
    %53 = arith.addf %50, %52 : vector<1x512xf32>
    %54 = arith.negf %53 : vector<1x512xf32>
    %55 = math.exp %54 : vector<1x512xf32>
    %cst_6 = arith.constant 1.000000e+00 : f32
    %56 = vector.broadcast %cst_6 : f32 to vector<1x512xf32>
    %57 = arith.addf %56, %55 : vector<1x512xf32>
    %58 = arith.divf %56, %57 : vector<1x512xf32>
    %c0_7 = arith.constant 0 : index
    %c0_8 = arith.constant 0 : index
    %59 = vector.load %arg3[%c0_7, %c0_8] : memref<1x512xf32, #tpu.memory_space<vmem>>, vector<1x512xf32>
    tpu.vector_store %arg3[%c0_7, %c0_8], %58 {strides = array<i32>} : memref<1x512xf32, #tpu.memory_space<vmem>>, vector<1x512xf32>,
    return
  }
  func.func @transform_0(%arg0: i32) -> (i32, i32) {
    %c0_i32 = arith.constant 0 : i32
    %c0_i32_0 = arith.constant 0 : i32
    return %c0_i32, %arg0 : i32, i32
  }
  func.func @transform_1(%arg0: i32) -> (i32, i32) {
    %c0_i32 = arith.constant 0 : i32
    %c0_i32_0 = arith.constant 0 : i32
    %c0_i32_1 = arith.constant 0 : i32
    return %c0_i32, %c0_i32_0 : i32, i32
  }
  func.func @transform_2(%arg0: i32) -> (i32, i32) {
    %c0_i32 = arith.constant 0 : i32
    %c0_i32_0 = arith.constant 0 : i32
    return %arg0, %c0_i32 : i32, i32
  }
}

</mosaic_0001>

<bundles_post_ra>
// kernel: tpu_custom_call.1
= control target key start
LH: loop header
LB: loop body
LE: loop exit
PB: predicated region body
PF: predicated region fallthrough
CT: control target
= control target key end

     0   :  { %7 = vsyncpa [#allocation3], 0  ;;  %s3816_s0 = inlined_call_operand.hbm [shape: s32[8,512], index: 0, kind: input, shape index: {}]   ;;  %s3817_s1 = inlined_call_operand.hbm [shape: bf16[40,128], index: 1, kind: input, shape index: {}]   ;;  %s3818_s2 = inlined_call_operand.hbm [shape: f32[1,512], index: 2, kind: output, shape index: {}]  }
   0x1   :  { %8 = vsyncpa [#allocation6], 0 }
   0x2   :  { %9 = vsyncpa [#allocation4], 0  ;;  %s15_s11 = sshll.u32 %s3816_s0, 4  ;;  %s2087_s12 = smov [#allocation2]   ;;  %s16_s11 = int_to_ptr.hbm [resolvable:$true] %s15_s11 }
   0x3   :  { %s17_s13 = sshll.u32 %s2087_s12, 4  ;;  %s25_s16 = sshll.u32 %s3817_s1, 4  ;;  %s18_s13 = int_to_ptr.vmem [resolvable:$true] %s17_s13  ;;  %s26_s16 = int_to_ptr.hbm [resolvable:$true] %s25_s16 }
   0x4   :  { %20 = dma.hbm_to_vmem [thread:$0]  %s16_s11, 512, %s18_s13, [#allocation3]  }
   0x5   :  { %s2088_s17 = smov [#allocation5]   ;;  %s2089_s19 = smov 64  }
   0x6   :  { %s27_s18 = sshll.u32 %s2088_s17, 4  ;;  %s2090_s20 = smov 4   ;;  %s28_s18 = int_to_ptr.vmem [resolvable:$true] %s27_s18 }
   0x7   :  { %33 = dma.hbm_to_vmem [thread:$0]  %s26_s16, 320, %s28_s18, [#allocation6], %s2089_s19, %s2089_s19, %s2090_s20  }
   0x8   :  { %2081 = dma.done.wait [#allocation3], 512  }
   0x9   :  { %2082 = vsyncadd [#allocation3], 4294966784 }
   0xa   :  { %2083 = dma.done.wait [#allocation6], 320  }
   0xb   :  { %2084 = vsyncadd [#allocation6], 4294966976  ;;  %v46_v0 = vlaneseq  ;;  %v42_v4 = vld [vmem:[#allocation2] sm:$0xff]  ;;  %v2091_v13 = vmov 0   ;;  %v43_v30 = vld [vmem:[#allocation2 + $0x8] sm:$0xff]  ;;  %s2092_s0 = smov [#allocation7]  }
   0xc   :  { %v2123_v5 = vperm.slane %v42_v4, 0  ;;  %v2125_v6 = vperm.slane %v42_v4, 1  ;;  %v2127_v7 = vperm.slane %v42_v4, 2  ;;  %v2129_v8 = vperm.slane %v42_v4, 3  ;;  %v2217_v59 = vld [vmem:[#allocation2 + $0x10] sm:$0xff]  ;;  %s1960_s1 = sshll.u32 %s2092_s0, 4  ;;  %s1961_s1 = int_to_ptr.vmem [resolvable:$true] %s1960_s1 }
   0xd   :  { %v2115_v1 = vshrl.u32 %v46_v0, 7  ;;  %v2131_v9 = vperm.slane %v42_v4, 4  ;;  %v2133_v10 = vperm.slane %v42_v4, 5  ;;  %v2135_v11 = vperm.slane %v42_v4, 6  ;;  %s1962_s23 = sshll.u32 %s3818_s2, 4  ;;  %s1963_s23 = int_to_ptr.hbm [resolvable:$true] %s1962_s23 }
   0xe   :  { %v2137_v12 = vperm.slane %v42_v4, 7  ;;  %v2185_v37 = vperm.slane %v43_v30, 0  ;;  %v2187_v38 = vperm.slane %v43_v30, 1  ;;  %v2203_v49 = vperm.slane %v43_v30, 2 }
   0xf   :  { %v2118_v2 = vadd.s32 112, %v2115_v1  ;;  %v2121_v3 = vadd.s32 120, %v2115_v1  ;;  %v2205_v50 = vperm.slane %v43_v30, 3 }
  0x11   :  { %vm123_vm0 = vcmp.eq.s32.totalorder %v2118_v2, %v2123_v5  ;;  %vm127_vm1 = vcmp.eq.s32.totalorder %v2121_v3, %v2123_v5  ;;  %vm255_vm2 = vcmp.eq.s32.totalorder %v2118_v2, %v2125_v6  ;;  %vm259_vm3 = vcmp.eq.s32.totalorder %v2121_v3, %v2125_v6 }
  0x12   :  { %v187_v14 = vsel %vm123_vm0, 1, %v2091_v13  ;;  %v191_v15 = vsel %vm127_vm1, 1, %v2091_v13  ;;  %v319_v16 = vsel %vm255_vm2, 1, %v2091_v13  ;;  %v323_v17 = vsel %vm259_vm3, 1, %v2091_v13 }
  0x13   :  { %v383_v18 = vadd.s32 %v319_v16, %v187_v14  ;;  %v387_v19 = vadd.s32 %v323_v17, %v191_v15  ;;  %vm451_vm4 = vcmp.eq.s32.totalorder %v2118_v2, %v2127_v7  ;;  %vm455_vm5 = vcmp.eq.s32.totalorder %v2121_v3, %v2127_v7 }
  0x14   :  { %v515_v20 = vsel %vm451_vm4, 1, %v2091_v13  ;;  %v519_v21 = vsel %vm455_vm5, 1, %v2091_v13  ;;  %vm647_vm6 = vcmp.eq.s32.totalorder %v2118_v2, %v2129_v8  ;;  %vm651_vm7 = vcmp.eq.s32.totalorder %v2121_v3, %v2129_v8 }
  0x15   :  { %v579_v22 = vadd.s32 %v515_v20, %v383_v18  ;;  %v583_v23 = vadd.s32 %v519_v21, %v387_v19  ;;  %v711_v24 = vsel %vm647_vm6, 1, %v2091_v13  ;;  %v715_v25 = vsel %vm651_vm7, 1, %v2091_v13 }
  0x16   :  { %vm843_vm8 = vcmp.eq.s32.totalorder %v2118_v2, %v2131_v9  ;;  %vm847_vm9 = vcmp.eq.s32.totalorder %v2121_v3, %v2131_v9  ;;  %vm1039_vm10 = vcmp.eq.s32.totalorder %v2118_v2, %v2133_v10  ;;  %vm1043_vm11 = vcmp.eq.s32.totalorder %v2121_v3, %v2133_v10 }
  0x17   :  { %v775_v26 = vadd.s32 %v711_v24, %v579_v22  ;;  %v779_v27 = vadd.s32 %v715_v25, %v583_v23  ;;  %v907_v28 = vsel %vm843_vm8, 1, %v2091_v13  ;;  %v911_v29 = vsel %vm847_vm9, 1, %v2091_v13 }
  0x18   :  { %v1103_v31 = vsel %vm1039_vm10, 1, %v2091_v13  ;;  %v1107_v32 = vsel %vm1043_vm11, 1, %v2091_v13  ;;  %vm1235_vm12 = vcmp.eq.s32.totalorder %v2118_v2, %v2135_v11  ;;  %vm1239_vm13 = vcmp.eq.s32.totalorder %v2121_v3, %v2135_v11 }
  0x19   :  { %v971_v33 = vadd.s32 %v907_v28, %v775_v26  ;;  %v975_v34 = vadd.s32 %v911_v29, %v779_v27  ;;  %v1299_v35 = vsel %vm1235_vm12, 1, %v2091_v13  ;;  %v1303_v36 = vsel %vm1239_vm13, 1, %v2091_v13 }
  0x1a   :  { %vm1431_vm14 = vcmp.eq.s32.totalorder %v2118_v2, %v2137_v12  ;;  %vm1435_vm15 = vcmp.eq.s32.totalorder %v2121_v3, %v2137_v12  ;;  %vm124_vm0 = vcmp.eq.s32.totalorder %v2118_v2, %v2185_v37  ;;  %vm128_vm1 = vcmp.eq.s32.totalorder %v2121_v3, %v2185_v37 }
  0x1b   :  { %v1167_v39 = vadd.s32 %v1103_v31, %v971_v33  ;;  %v1171_v40 = vadd.s32 %v1107_v32, %v975_v34  ;;  %v1495_v41 = vsel %vm1431_vm14, 1, %v2091_v13  ;;  %v1499_v42 = vsel %vm1435_vm15, 1, %v2091_v13 }
  0x1c   :  { %vm256_vm2 = vcmp.eq.s32.totalorder %v2118_v2, %v2187_v38  ;;  %vm260_vm3 = vcmp.eq.s32.totalorder %v2121_v3, %v2187_v38  ;;  %v188_v45 = vsel %vm124_vm0, 1, %v2091_v13  ;;  %v192_v46 = vsel %vm128_vm1, 1, %v2091_v13 }
  0x1d   :  { %v1363_v43 = vadd.s32 %v1299_v35, %v1167_v39  ;;  %v1367_v44 = vadd.s32 %v1303_v36, %v1171_v40  ;;  %v320_v47 = vsel %vm256_vm2, 1, %v2091_v13  ;;  %v324_v48 = vsel %vm260_vm3, 1, %v2091_v13 }
  0x1e   :  { %v384_v53 = vadd.s32 %v320_v47, %v188_v45  ;;  %v388_v54 = vadd.s32 %v324_v48, %v192_v46  ;;  %vm452_vm4 = vcmp.eq.s32.totalorder %v2118_v2, %v2203_v49  ;;  %vm456_vm5 = vcmp.eq.s32.totalorder %v2121_v3, %v2203_v49 }
  0x1f   :  { %v1559_v51 = vadd.s32 %v1495_v41, %v1363_v43  ;;  %v1563_v52 = vadd.s32 %v1499_v42, %v1367_v44  ;;  %vm648_vm6 = vcmp.eq.s32.totalorder %v2118_v2, %v2205_v50  ;;  %vm652_vm7 = vcmp.eq.s32.totalorder %v2121_v3, %v2205_v50 }
  0x20   :  { %v516_v57 = vsel %vm452_vm4, 1, %v2091_v13  ;;  %v520_v58 = vsel %vm456_vm5, 1, %v2091_v13  ;;  %v712_v62 = vsel %vm648_vm6, 1, %v2091_v13  ;;  %v716_v63 = vsel %vm652_vm7, 1, %v2091_v13 }
  0x21   :  { %v1623_v55 = vcvt.s32.f32 %v1559_v51  ;;  %v1627_v56 = vcvt.s32.f32 %v1563_v52  ;;  %v580_v60 = vadd.s32 %v516_v57, %v384_v53  ;;  %v584_v61 = vadd.s32 %v520_v58, %v388_v54 }
  0x22   :  { %v2221_v14 = vperm.slane %v43_v30, 4  ;;  %v2223_v15 = vperm.slane %v43_v30, 5  ;;  %v2225_v16 = vperm.slane %v43_v30, 6  ;;  %v2227_v19 = vperm.slane %v43_v30, 7 }
  0x23   :  { %v1659_v4 = vpack.c.bf16 %v1627_v56, %v1623_v55  ;;  %v776_v17 = vadd.s32 %v712_v62, %v580_v60  ;;  %v780_v18 = vadd.s32 %v716_v63, %v584_v61  ;;  %v2230_v20 = vperm.slane %v2217_v59, 0 }
  0x24   :  { %vm844_vm8 = vcmp.eq.s32.totalorder %v2118_v2, %v2221_v14  ;;  %vm848_vm9 = vcmp.eq.s32.totalorder %v2121_v3, %v2221_v14  ;;  %vm1040_vm10 = vcmp.eq.s32.totalorder %v2118_v2, %v2223_v15  ;;  %vm1044_vm11 = vcmp.eq.s32.totalorder %v2121_v3, %v2223_v15 }
  0x25   :  { %1684 = vmatpush.bf16.msra.mxu0 %v1659_v4  ;;  %v908_v21 = vsel %vm844_vm8, 1, %v2091_v13  ;;  %v912_v22 = vsel %vm848_vm9, 1, %v2091_v13  ;;  %v1104_v23 = vsel %vm1040_vm10, 1, %v2091_v13  ;;  %v1108_v24 = vsel %vm1044_vm11, 1, %v2091_v13 }
  0x26   :  { %v972_v25 = vadd.s32 %v908_v21, %v776_v17  ;;  %v976_v26 = vadd.s32 %v912_v22, %v780_v18  ;;  %vm1236_vm12 = vcmp.eq.s32.totalorder %v2118_v2, %v2225_v16  ;;  %vm1240_vm13 = vcmp.eq.s32.totalorder %v2121_v3, %v2225_v16  ;;  %v45_v21 = vld [vmem:[#allocation2 + $0x18] sm:$0xff] }
  0x27   :  { %v1300_v27 = vsel %vm1236_vm12, 1, %v2091_v13  ;;  %v1304_v28 = vsel %vm1240_vm13, 1, %v2091_v13  ;;  %vm1432_vm14 = vcmp.eq.s32.totalorder %v2118_v2, %v2227_v19  ;;  %vm1436_vm15 = vcmp.eq.s32.totalorder %v2121_v3, %v2227_v19 }
  0x28   :  { %v1168_v29 = vadd.s32 %v1104_v23, %v972_v25  ;;  %v1172_v30 = vadd.s32 %v1108_v24, %v976_v26  ;;  %v1496_v31 = vsel %vm1432_vm14, 1, %v2091_v13  ;;  %v1500_v32 = vsel %vm1436_vm15, 1, %v2091_v13 }
  0x29   :  { %vm125_vm0 = vcmp.eq.s32.totalorder %v2118_v2, %v2230_v20  ;;  %vm129_vm1 = vcmp.eq.s32.totalorder %v2121_v3, %v2230_v20  ;;  %v2261_v33 = vperm.slane %v2217_v59, 1  ;;  %v2264_v34 = vperm.slane %v2217_v59, 2 }
  0x2a   :  { %v1364_v35 = vadd.s32 %v1300_v27, %v1168_v29  ;;  %v1368_v36 = vadd.s32 %v1304_v28, %v1172_v30  ;;  %v189_v39 = vsel %vm125_vm0, 1, %v2091_v13  ;;  %v193_v40 = vsel %vm129_vm1, 1, %v2091_v13 }
  0x2b   :  { %vm257_vm2 = vcmp.eq.s32.totalorder %v2118_v2, %v2261_v33  ;;  %vm261_vm3 = vcmp.eq.s32.totalorder %v2121_v3, %v2261_v33  ;;  %vm453_vm4 = vcmp.eq.s32.totalorder %v2118_v2, %v2264_v34  ;;  %vm457_vm5 = vcmp.eq.s32.totalorder %v2121_v3, %v2264_v34 }
  0x2c   :  { %v1560_v41 = vadd.s32 %v1496_v31, %v1364_v35  ;;  %v1564_v42 = vadd.s32 %v1500_v32, %v1368_v36  ;;  %v321_v43 = vsel %vm257_vm2, 1, %v2091_v13  ;;  %v325_v44 = vsel %vm261_vm3, 1, %v2091_v13 }
  0x2d   :  { %v385_v45 = vadd.s32 %v321_v43, %v189_v39  ;;  %v389_v46 = vadd.s32 %v325_v44, %v193_v40  ;;  %v517_v47 = vsel %vm453_vm4, 1, %v2091_v13  ;;  %v521_v48 = vsel %vm457_vm5, 1, %v2091_v13 }
  0x2e   :  { %v1624_v51 = vcvt.s32.f32 %v1560_v41  ;;  %v1628_v52 = vcvt.s32.f32 %v1564_v42  ;;  %v2281_v53 = vperm.slane %v2217_v59, 3  ;;  %v2284_v54 = vperm.slane %v2217_v59, 4 }
  0x2f   :  { %v581_v55 = vadd.s32 %v517_v47, %v385_v45  ;;  %v585_v56 = vadd.s32 %v521_v48, %v389_v46  ;;  %v2287_v57 = vperm.slane %v2217_v59, 5  ;;  %v2290_v58 = vperm.slane %v2217_v59, 6 }
  0x30   :  { %v1660_v60 = vpack.c.bf16 %v1628_v52, %v1624_v51  ;;  %vm649_vm6 = vcmp.eq.s32.totalorder %v2118_v2, %v2281_v53  ;;  %vm653_vm7 = vcmp.eq.s32.totalorder %v2121_v3, %v2281_v53  ;;  %vm845_vm8 = vcmp.eq.s32.totalorder %v2118_v2, %v2284_v54 }
  0x31   :  { %v713_v61 = vsel %vm649_vm6, 1, %v2091_v13  ;;  %v717_v62 = vsel %vm653_vm7, 1, %v2091_v13  ;;  %vm849_vm9 = vcmp.eq.s32.totalorder %v2121_v3, %v2284_v54  ;;  %v909_v63 = vsel %vm845_vm8, 1, %v2091_v13 }
  0x32   :  { %1707 = vmatpush.bf16.msra.mxu1 %v1660_v60  ;;  %v777_v4 = vadd.s32 %v713_v61, %v581_v55  ;;  %v781_v17 = vadd.s32 %v717_v62, %v585_v56  ;;  %v913_v18 = vsel %vm849_vm9, 1, %v2091_v13  ;;  %vm1041_vm10 = vcmp.eq.s32.totalorder %v2118_v2, %v2287_v57 }
  0x33   :  { %vm1045_vm11 = vcmp.eq.s32.totalorder %v2121_v3, %v2287_v57  ;;  %v1105_v22 = vsel %vm1041_vm10, 1, %v2091_v13  ;;  %vm1237_vm12 = vcmp.eq.s32.totalorder %v2118_v2, %v2290_v58  ;;  %vm1241_vm13 = vcmp.eq.s32.totalorder %v2121_v3, %v2290_v58 }
  0x34   :  { %v973_v23 = vadd.s32 %v909_v63, %v777_v4  ;;  %v977_v24 = vadd.s32 %v913_v18, %v781_v17  ;;  %v1109_v25 = vsel %vm1045_vm11, 1, %v2091_v13  ;;  %v1301_v26 = vsel %vm1237_vm12, 1, %v2091_v13 }
  0x35   :  { %v1305_v27 = vsel %vm1241_vm13, 1, %v2091_v13  ;;  %v2317_v28 = vperm.slane %v2217_v59, 7  ;;  %v2319_v29 = vperm.slane %v45_v21, 0  ;;  %v2321_v30 = vperm.slane %v45_v21, 1 }
  0x36   :  { %v1169_v31 = vadd.s32 %v1105_v22, %v973_v23  ;;  %v1173_v32 = vadd.s32 %v1109_v25, %v977_v24  ;;  %v2323_v35 = vperm.slane %v45_v21, 2  ;;  %v2325_v36 = vperm.slane %v45_v21, 3 }
  0x37   :  { %vm1433_vm14 = vcmp.eq.s32.totalorder %v2118_v2, %v2317_v28  ;;  %vm1437_vm15 = vcmp.eq.s32.totalorder %v2121_v3, %v2317_v28  ;;  %vm126_vm0 = vcmp.eq.s32.totalorder %v2118_v2, %v2319_v29  ;;  %vm130_vm1 = vcmp.eq.s32.totalorder %v2121_v3, %v2319_v29 }
  0x38   :  { %v1365_v59 = vadd.s32 %v1301_v26, %v1169_v31  ;;  %v1369_v39 = vadd.s32 %v1305_v27, %v1173_v32  ;;  %v1497_v40 = vsel %vm1433_vm14, 1, %v2091_v13  ;;  %v1501_v41 = vsel %vm1437_vm15, 1, %v2091_v13 }
  0x39   :  { %v190_v42 = vsel %vm126_vm0, 1, %v2091_v13  ;;  %v194_v43 = vsel %vm130_vm1, 1, %v2091_v13  ;;  %vm258_vm2 = vcmp.eq.s32.totalorder %v2118_v2, %v2321_v30  ;;  %vm262_vm3 = vcmp.eq.s32.totalorder %v2121_v3, %v2321_v30 }
  0x3a   :  { %v1561_v44 = vadd.s32 %v1497_v40, %v1365_v59  ;;  %v1565_v45 = vadd.s32 %v1501_v41, %v1369_v39  ;;  %v322_v46 = vsel %vm258_vm2, 1, %v2091_v13  ;;  %v326_v47 = vsel %vm262_vm3, 1, %v2091_v13 }
  0x3b   :  { %v386_v48 = vadd.s32 %v322_v46, %v190_v42  ;;  %v390_v51 = vadd.s32 %v326_v47, %v194_v43  ;;  %vm454_vm4 = vcmp.eq.s32.totalorder %v2118_v2, %v2323_v35  ;;  %vm458_vm5 = vcmp.eq.s32.totalorder %v2121_v3, %v2323_v35 }
  0x3c   :  { %v1625_v52 = vcvt.s32.f32 %v1561_v44  ;;  %v1629_v55 = vcvt.s32.f32 %v1565_v45  ;;  %v518_v56 = vsel %vm454_vm4, 1, %v2091_v13  ;;  %v522_v60 = vsel %vm458_vm5, 1, %v2091_v13 }
  0x3d   :  { %v582_v61 = vadd.s32 %v518_v56, %v386_v48  ;;  %v586_v62 = vadd.s32 %v522_v60, %v390_v51  ;;  %vm650_vm6 = vcmp.eq.s32.totalorder %v2118_v2, %v2325_v36  ;;  %vm654_vm7 = vcmp.eq.s32.totalorder %v2121_v3, %v2325_v36 }
  0x3e   :  { %v1661_v63 = vpack.c.bf16 %v1629_v55, %v1625_v52  ;;  %v714_v4 = vsel %vm650_vm6, 1, %v2091_v13  ;;  %v718_v17 = vsel %vm654_vm7, 1, %v2091_v13  ;;  %v2357_v18 = vperm.slane %v45_v21, 4 }
  0x3f   :  { %v778_v22 = vadd.s32 %v714_v4, %v582_v61  ;;  %v782_v23 = vadd.s32 %v718_v17, %v586_v62  ;;  %v2359_v24 = vperm.slane %v45_v21, 5  ;;  %v2361_v25 = vperm.slane %v45_v21, 6 }
  0x40   :  { %1730 = vmatpush.bf16.msra.mxu2 %v1661_v63  ;;  %vm846_vm8 = vcmp.eq.s32.totalorder %v2118_v2, %v2357_v18  ;;  %vm850_vm9 = vcmp.eq.s32.totalorder %v2121_v3, %v2357_v18  ;;  %v2367_v26 = vperm.slane %v45_v21, 7  ;;  %v2370_v27 = vadd.s32 96, %v2115_v1 }
  0x41   :  { %v910_v31 = vsel %vm846_vm8, 1, %v2091_v13  ;;  %v914_v32 = vsel %vm850_vm9, 1, %v2091_v13  ;;  %vm1042_vm10 = vcmp.eq.s32.totalorder %v2118_v2, %v2359_v24  ;;  %vm1046_vm11 = vcmp.eq.s32.totalorder %v2121_v3, %v2359_v24 }
  0x42   :  { %v974_v59 = vadd.s32 %v910_v31, %v778_v22  ;;  %v978_v39 = vadd.s32 %v914_v32, %v782_v23  ;;  %v1106_v40 = vsel %vm1042_vm10, 1, %v2091_v13  ;;  %v1110_v21 = vsel %vm1046_vm11, 1, %v2091_v13 }
  0x43   :  { %vm1238_vm12 = vcmp.eq.s32.totalorder %v2118_v2, %v2361_v25  ;;  %vm1242_vm13 = vcmp.eq.s32.totalorder %v2121_v3, %v2361_v25  ;;  %vm1434_vm14 = vcmp.eq.s32.totalorder %v2118_v2, %v2367_v26  ;;  %vm1438_vm15 = vcmp.eq.s32.totalorder %v2121_v3, %v2367_v26 }
  0x44   :  { %v1170_v41 = vadd.s32 %v1106_v40, %v974_v59  ;;  %v1174_v42 = vadd.s32 %v1110_v21, %v978_v39  ;;  %v1302_v43 = vsel %vm1238_vm12, 1, %v2091_v13  ;;  %v1306_v44 = vsel %vm1242_vm13, 1, %v2091_v13 }
  0x45   :  { %v1498_v45 = vsel %vm1434_vm14, 1, %v2091_v13  ;;  %v1502_v46 = vsel %vm1438_vm15, 1, %v2091_v13  ;;  %v2393_v47 = vadd.s32 104, %v2115_v1  ;;  %vm115_vm0 = vcmp.eq.s32.totalorder %v2370_v27, %v2123_v5 }
  0x46   :  { %v1366_v2 = vadd.s32 %v1302_v43, %v1170_v41  ;;  %v1370_v48 = vadd.s32 %v1306_v44, %v1174_v42  ;;  %v179_v3 = vsel %vm115_vm0, 1, %v2091_v13  ;;  %vm247_vm1 = vcmp.eq.s32.totalorder %v2370_v27, %v2125_v6 }
  0x47   :  { %vm119_vm2 = vcmp.eq.s32.totalorder %v2393_v47, %v2123_v5  ;;  %vm251_vm3 = vcmp.eq.s32.totalorder %v2393_v47, %v2125_v6  ;;  %v311_v51 = vsel %vm247_vm1, 1, %v2091_v13  ;;  %vm443_vm4 = vcmp.eq.s32.totalorder %v2370_v27, %v2127_v7 }
  0x48   :  { %v1562_v52 = vadd.s32 %v1498_v45, %v1366_v2  ;;  %v1566_v55 = vadd.s32 %v1502_v46, %v1370_v48  ;;  %v183_v56 = vsel %vm119_vm2, 1, %v2091_v13  ;;  %v315_v60 = vsel %vm251_vm3, 1, %v2091_v13 }
  0x49   :  { %v375_v61 = vadd.s32 %v311_v51, %v179_v3  ;;  %v379_v62 = vadd.s32 %v315_v60, %v183_v56  ;;  %vm447_vm5 = vcmp.eq.s32.totalorder %v2393_v47, %v2127_v7  ;;  %v507_v63 = vsel %vm443_vm4, 1, %v2091_v13 }
  0x4a   :  { %v1626_v4 = vcvt.s32.f32 %v1562_v52  ;;  %v1630_v17 = vcvt.s32.f32 %v1566_v55  ;;  %v511_v22 = vsel %vm447_vm5, 1, %v2091_v13  ;;  %vm639_vm6 = vcmp.eq.s32.totalorder %v2370_v27, %v2129_v8 }
  0x4b   :  { %v571_v23 = vadd.s32 %v507_v63, %v375_v61  ;;  %v575_v31 = vadd.s32 %v511_v22, %v379_v62  ;;  %vm643_vm7 = vcmp.eq.s32.totalorder %v2393_v47, %v2129_v8  ;;  %v703_v32 = vsel %vm639_vm6, 1, %v2091_v13 }
  0x4c   :  { %v1662_v59 = vpack.c.bf16 %v1630_v17, %v1626_v4  ;;  %v707_v39 = vsel %vm643_vm7, 1, %v2091_v13  ;;  %vm835_vm8 = vcmp.eq.s32.totalorder %v2370_v27, %v2131_v9  ;;  %vm839_vm9 = vcmp.eq.s32.totalorder %v2393_v47, %v2131_v9 }
  0x4d   :  { %v767_v40 = vadd.s32 %v703_v32, %v571_v23  ;;  %v771_v21 = vadd.s32 %v707_v39, %v575_v31  ;;  %v899_v41 = vsel %vm835_vm8, 1, %v2091_v13  ;;  %v903_v42 = vsel %vm839_vm9, 1, %v2091_v13 }
  0x4e   :  { %1753 = vmatpush.bf16.msra.mxu3 %v1662_v59  ;;  %vm1031_vm10 = vcmp.eq.s32.totalorder %v2370_v27, %v2133_v10  ;;  %vm1035_vm11 = vcmp.eq.s32.totalorder %v2393_v47, %v2133_v10  ;;  %vm1227_vm12 = vcmp.eq.s32.totalorder %v2370_v27, %v2135_v11  ;;  %vm1231_vm13 = vcmp.eq.s32.totalorder %v2393_v47, %v2135_v11 }
  0x4f   :  { %v963_v43 = vadd.s32 %v899_v41, %v767_v40  ;;  %v967_v44 = vadd.s32 %v903_v42, %v771_v21  ;;  %v1095_v45 = vsel %vm1031_vm10, 1, %v2091_v13  ;;  %v1099_v46 = vsel %vm1035_vm11, 1, %v2091_v13 }
  0x50   :  { %v1291_v2 = vsel %vm1227_vm12, 1, %v2091_v13  ;;  %v1295_v48 = vsel %vm1231_vm13, 1, %v2091_v13  ;;  %vm1423_vm14 = vcmp.eq.s32.totalorder %v2370_v27, %v2137_v12  ;;  %vm1427_vm15 = vcmp.eq.s32.totalorder %v2393_v47, %v2137_v12 }
  0x51   :  { %v1159_v3 = vadd.s32 %v1095_v45, %v963_v43  ;;  %v1163_v51 = vadd.s32 %v1099_v46, %v967_v44  ;;  %v1487_v52 = vsel %vm1423_vm14, 1, %v2091_v13  ;;  %v1491_v55 = vsel %vm1427_vm15, 1, %v2091_v13 }
  0x52   :  { %vm116_vm0 = vcmp.eq.s32.totalorder %v2370_v27, %v2185_v37  ;;  %vm120_vm1 = vcmp.eq.s32.totalorder %v2393_v47, %v2185_v37  ;;  %vm248_vm2 = vcmp.eq.s32.totalorder %v2370_v27, %v2187_v38  ;;  %vm252_vm3 = vcmp.eq.s32.totalorder %v2393_v47, %v2187_v38 }
  0x53   :  { %v1355_v56 = vadd.s32 %v1291_v2, %v1159_v3  ;;  %v1359_v60 = vadd.s32 %v1295_v48, %v1163_v51  ;;  %v180_v61 = vsel %vm116_vm0, 1, %v2091_v13  ;;  %v184_v62 = vsel %vm120_vm1, 1, %v2091_v13 }
  0x54   :  { %v312_v63 = vsel %vm248_vm2, 1, %v2091_v13  ;;  %v316_v4 = vsel %vm252_vm3, 1, %v2091_v13  ;;  %vm444_vm4 = vcmp.eq.s32.totalorder %v2370_v27, %v2203_v49  ;;  %vm448_vm5 = vcmp.eq.s32.totalorder %v2393_v47, %v2203_v49 }
  0x55   :  { %v1551_v17 = vadd.s32 %v1487_v52, %v1355_v56  ;;  %v1555_v22 = vadd.s32 %v1491_v55, %v1359_v60  ;;  %v376_v23 = vadd.s32 %v312_v63, %v180_v61  ;;  %v380_v31 = vadd.s32 %v316_v4, %v184_v62 }
  0x56   :  { %v508_v32 = vsel %vm444_vm4, 1, %v2091_v13  ;;  %v512_v59 = vsel %vm448_vm5, 1, %v2091_v13  ;;  %vm640_vm6 = vcmp.eq.s32.totalorder %v2370_v27, %v2205_v50  ;;  %vm644_vm7 = vcmp.eq.s32.totalorder %v2393_v47, %v2205_v50 }
  0x57   :  { %v1615_v39 = vcvt.s32.f32 %v1551_v17  ;;  %v1619_v40 = vcvt.s32.f32 %v1555_v22  ;;  %v572_v21 = vadd.s32 %v508_v32, %v376_v23  ;;  %v576_v41 = vadd.s32 %v512_v59, %v380_v31 }
  0x58   :  { %v704_v42 = vsel %vm640_vm6, 1, %v2091_v13  ;;  %v708_v43 = vsel %vm644_vm7, 1, %v2091_v13  ;;  %vm836_vm8 = vcmp.eq.s32.totalorder %v2370_v27, %v2221_v14  ;;  %vm840_vm9 = vcmp.eq.s32.totalorder %v2393_v47, %v2221_v14 }
  0x59   :  { %v1655_v44 = vpack.c.bf16 %v1619_v40, %v1615_v39  ;;  %v768_v45 = vadd.s32 %v704_v42, %v572_v21  ;;  %v772_v46 = vadd.s32 %v708_v43, %v576_v41  ;;  %v900_v2 = vsel %vm836_vm8, 1, %v2091_v13 }
  0x5a   :  { %v904_v48 = vsel %vm840_vm9, 1, %v2091_v13  ;;  %vm1032_vm10 = vcmp.eq.s32.totalorder %v2370_v27, %v2223_v15  ;;  %vm1036_vm11 = vcmp.eq.s32.totalorder %v2393_v47, %v2223_v15  ;;  %vm1228_vm12 = vcmp.eq.s32.totalorder %v2370_v27, %v2225_v16 }
  0x5b   :  { %1685 = vmatpush.bf16.msra.mxu0 %v1655_v44  ;;  %v964_v3 = vadd.s32 %v900_v2, %v768_v45  ;;  %v968_v51 = vadd.s32 %v904_v48, %v772_v46  ;;  %v1096_v52 = vsel %vm1032_vm10, 1, %v2091_v13  ;;  %v1100_v55 = vsel %vm1036_vm11, 1, %v2091_v13 }
  0x5c   :  { %vm1232_vm13 = vcmp.eq.s32.totalorder %v2393_v47, %v2225_v16  ;;  %v1292_v56 = vsel %vm1228_vm12, 1, %v2091_v13  ;;  %vm1424_vm14 = vcmp.eq.s32.totalorder %v2370_v27, %v2227_v19  ;;  %vm1428_vm15 = vcmp.eq.s32.totalorder %v2393_v47, %v2227_v19 }
  0x5d   :  { %v1160_v60 = vadd.s32 %v1096_v52, %v964_v3  ;;  %v1164_v61 = vadd.s32 %v1100_v55, %v968_v51  ;;  %v1296_v62 = vsel %vm1232_vm13, 1, %v2091_v13  ;;  %v1488_v63 = vsel %vm1424_vm14, 1, %v2091_v13 }
  0x5e   :  { %v1492_v4 = vsel %vm1428_vm15, 1, %v2091_v13  ;;  %vm117_vm0 = vcmp.eq.s32.totalorder %v2370_v27, %v2230_v20  ;;  %vm121_vm1 = vcmp.eq.s32.totalorder %v2393_v47, %v2230_v20  ;;  %vm249_vm2 = vcmp.eq.s32.totalorder %v2370_v27, %v2261_v33 }
  0x5f   :  { %v1356_v17 = vadd.s32 %v1292_v56, %v1160_v60  ;;  %v1360_v22 = vadd.s32 %v1296_v62, %v1164_v61  ;;  %v181_v23 = vsel %vm117_vm0, 1, %v2091_v13  ;;  %v185_v31 = vsel %vm121_vm1, 1, %v2091_v13 }
  0x60   :  { %vm253_vm3 = vcmp.eq.s32.totalorder %v2393_v47, %v2261_v33  ;;  %v313_v32 = vsel %vm249_vm2, 1, %v2091_v13  ;;  %vm445_vm4 = vcmp.eq.s32.totalorder %v2370_v27, %v2264_v34  ;;  %vm449_vm5 = vcmp.eq.s32.totalorder %v2393_v47, %v2264_v34 }
  0x61   :  { %v1552_v59 = vadd.s32 %v1488_v63, %v1356_v17  ;;  %v1556_v39 = vadd.s32 %v1492_v4, %v1360_v22  ;;  %v317_v40 = vsel %vm253_vm3, 1, %v2091_v13  ;;  %v377_v21 = vadd.s32 %v313_v32, %v181_v23 }
  0x62   :  { %v381_v41 = vadd.s32 %v317_v40, %v185_v31  ;;  %v509_v42 = vsel %vm445_vm4, 1, %v2091_v13  ;;  %v513_v43 = vsel %vm449_vm5, 1, %v2091_v13  ;;  %vm641_vm6 = vcmp.eq.s32.totalorder %v2370_v27, %v2281_v53 }
  0x63   :  { %v1616_v44 = vcvt.s32.f32 %v1552_v59  ;;  %v1620_v45 = vcvt.s32.f32 %v1556_v39  ;;  %v573_v46 = vadd.s32 %v509_v42, %v377_v21  ;;  %vm645_vm7 = vcmp.eq.s32.totalorder %v2393_v47, %v2281_v53 }
  0x64   :  { %v577_v2 = vadd.s32 %v513_v43, %v381_v41  ;;  %v705_v48 = vsel %vm641_vm6, 1, %v2091_v13  ;;  %v709_v3 = vsel %vm645_vm7, 1, %v2091_v13  ;;  %vm837_vm8 = vcmp.eq.s32.totalorder %v2370_v27, %v2284_v54 }
  0x65   :  { %v1656_v51 = vpack.c.bf16 %v1620_v45, %v1616_v44  ;;  %v769_v52 = vadd.s32 %v705_v48, %v573_v46  ;;  %vm841_vm9 = vcmp.eq.s32.totalorder %v2393_v47, %v2284_v54  ;;  %v901_v55 = vsel %vm837_vm8, 1, %v2091_v13 }
  0x66   :  { %v773_v56 = vadd.s32 %v709_v3, %v577_v2  ;;  %v905_v60 = vsel %vm841_vm9, 1, %v2091_v13  ;;  %vm1033_vm10 = vcmp.eq.s32.totalorder %v2370_v27, %v2287_v57  ;;  %vm1037_vm11 = vcmp.eq.s32.totalorder %v2393_v47, %v2287_v57 }
  0x67   :  { %1708 = vmatpush.bf16.msra.mxu1 %v1656_v51  ;;  %v965_v61 = vadd.s32 %v901_v55, %v769_v52  ;;  %v1097_v62 = vsel %vm1033_vm10, 1, %v2091_v13  ;;  %v1101_v63 = vsel %vm1037_vm11, 1, %v2091_v13  ;;  %vm1229_vm12 = vcmp.eq.s32.totalorder %v2370_v27, %v2290_v58 }
  0x68   :  { %v969_v4 = vadd.s32 %v905_v60, %v773_v56  ;;  %vm1233_vm13 = vcmp.eq.s32.totalorder %v2393_v47, %v2290_v58  ;;  %v1293_v17 = vsel %vm1229_vm12, 1, %v2091_v13  ;;  %vm1425_vm14 = vcmp.eq.s32.totalorder %v2370_v27, %v2317_v28 }
  0x69   :  { %v1161_v22 = vadd.s32 %v1097_v62, %v965_v61  ;;  %v1297_v23 = vsel %vm1233_vm13, 1, %v2091_v13  ;;  %vm1429_vm15 = vcmp.eq.s32.totalorder %v2393_v47, %v2317_v28  ;;  %v1489_v31 = vsel %vm1425_vm14, 1, %v2091_v13 }
  0x6a   :  { %v1165_v32 = vadd.s32 %v1101_v63, %v969_v4  ;;  %v1493_v59 = vsel %vm1429_vm15, 1, %v2091_v13  ;;  %vm118_vm0 = vcmp.eq.s32.totalorder %v2370_v27, %v2319_v29  ;;  %vm122_vm1 = vcmp.eq.s32.totalorder %v2393_v47, %v2319_v29 }
  0x6b   :  { %v1357_v39 = vadd.s32 %v1293_v17, %v1161_v22  ;;  %v182_v40 = vsel %vm118_vm0, 1, %v2091_v13  ;;  %v186_v21 = vsel %vm122_vm1, 1, %v2091_v13  ;;  %vm250_vm2 = vcmp.eq.s32.totalorder %v2370_v27, %v2321_v30 }
  0x6c   :  { %v1361_v41 = vadd.s32 %v1297_v23, %v1165_v32  ;;  %vm254_vm3 = vcmp.eq.s32.totalorder %v2393_v47, %v2321_v30  ;;  %v314_v42 = vsel %vm250_vm2, 1, %v2091_v13  ;;  %vm446_vm4 = vcmp.eq.s32.totalorder %v2370_v27, %v2323_v35 }
  0x6d   :  { %v1553_v43 = vadd.s32 %v1489_v31, %v1357_v39  ;;  %v318_v44 = vsel %vm254_vm3, 1, %v2091_v13  ;;  %v378_v45 = vadd.s32 %v314_v42, %v182_v40  ;;  %vm450_vm5 = vcmp.eq.s32.totalorder %v2393_v47, %v2323_v35 }
  0x6e   :  { %v1557_v46 = vadd.s32 %v1493_v59, %v1361_v41  ;;  %v382_v2 = vadd.s32 %v318_v44, %v186_v21  ;;  %v510_v48 = vsel %vm446_vm4, 1, %v2091_v13  ;;  %v514_v3 = vsel %vm450_vm5, 1, %v2091_v13 }
  0x6f   :  { %v1617_v51 = vcvt.s32.f32 %v1553_v43  ;;  %v574_v52 = vadd.s32 %v510_v48, %v378_v45  ;;  %vm642_vm6 = vcmp.eq.s32.totalorder %v2370_v27, %v2325_v36  ;;  %vm646_vm7 = vcmp.eq.s32.totalorder %v2393_v47, %v2325_v36 }
  0x70   :  { %v1621_v55 = vcvt.s32.f32 %v1557_v46  ;;  %v578_v56 = vadd.s32 %v514_v3, %v382_v2  ;;  %v706_v60 = vsel %vm642_vm6, 1, %v2091_v13  ;;  %v710_v61 = vsel %vm646_vm7, 1, %v2091_v13 }
  0x71   :  { %v770_v62 = vadd.s32 %v706_v60, %v574_v52  ;;  %vm838_vm8 = vcmp.eq.s32.totalorder %v2370_v27, %v2357_v18  ;;  %vm842_vm9 = vcmp.eq.s32.totalorder %v2393_v47, %v2357_v18  ;;  %vm1034_vm10 = vcmp.eq.s32.totalorder %v2370_v27, %v2359_v24 }
  0x72   :  { %v1657_v63 = vpack.c.bf16 %v1621_v55, %v1617_v51  ;;  %v774_v4 = vadd.s32 %v710_v61, %v578_v56  ;;  %v902_v17 = vsel %vm838_vm8, 1, %v2091_v13  ;;  %v906_v22 = vsel %vm842_vm9, 1, %v2091_v13 }
  0x73   :  { %v966_v23 = vadd.s32 %v902_v17, %v770_v62  ;;  %vm1038_vm11 = vcmp.eq.s32.totalorder %v2393_v47, %v2359_v24  ;;  %v1098_v31 = vsel %vm1034_vm10, 1, %v2091_v13  ;;  %vm1230_vm12 = vcmp.eq.s32.totalorder %v2370_v27, %v2361_v25 }
  0x74   :  { %1731 = vmatpush.bf16.msra.mxu2 %v1657_v63  ;;  %v970_v32 = vadd.s32 %v906_v22, %v774_v4  ;;  %v1102_v59 = vsel %vm1038_vm11, 1, %v2091_v13  ;;  %vm1234_vm13 = vcmp.eq.s32.totalorder %v2393_v47, %v2361_v25  ;;  %v1294_v39 = vsel %vm1230_vm12, 1, %v2091_v13 }
  0x75   :  { %v1162_v40 = vadd.s32 %v1098_v31, %v966_v23  ;;  %v1298_v21 = vsel %vm1234_vm13, 1, %v2091_v13  ;;  %vm1426_vm14 = vcmp.eq.s32.totalorder %v2370_v27, %v2367_v26  ;;  %vm1430_vm15 = vcmp.eq.s32.totalorder %v2393_v47, %v2367_v26 }
  0x76   :  { %v1166_v41 = vadd.s32 %v1102_v59, %v970_v32  ;;  %v1490_v42 = vsel %vm1426_vm14, 1, %v2091_v13  ;;  %v2587_v43 = vadd.s32 80, %v2115_v1  ;;  %v1494_v45 = vsel %vm1430_vm15, 1, %v2091_v13 }
  0x77   :  { %v1358_v44 = vadd.s32 %v1294_v39, %v1162_v40  ;;  %v2591_v46 = vadd.s32 88, %v2115_v1 }
  0x78   :  { %v1362_v2 = vadd.s32 %v1298_v21, %v1166_v41  ;;  %vm107_vm0 = vcmp.eq.s32.totalorder %v2587_v43, %v2123_v5  ;;  %vm239_vm1 = vcmp.eq.s32.totalorder %v2587_v43, %v2125_v6  ;;  %vm435_vm2 = vcmp.eq.s32.totalorder %v2587_v43, %v2127_v7 }
  0x79   :  { %v1554_v27 = vadd.s32 %v1490_v42, %v1358_v44  ;;  %vm111_vm3 = vcmp.eq.s32.totalorder %v2591_v46, %v2123_v5  ;;  %v171_v47 = vsel %vm107_vm0, 1, %v2091_v13  ;;  %vm243_vm4 = vcmp.eq.s32.totalorder %v2591_v46, %v2125_v6 }
  0x7a   :  { %v1558_v48 = vadd.s32 %v1494_v45, %v1362_v2  ;;  %v175_v3 = vsel %vm111_vm3, 1, %v2091_v13  ;;  %v303_v51 = vsel %vm239_vm1, 1, %v2091_v13  ;;  %v307_v52 = vsel %vm243_vm4, 1, %v2091_v13 }
  0x7b   :  { %v1618_v55 = vcvt.s32.f32 %v1554_v27  ;;  %v367_v56 = vadd.s32 %v303_v51, %v171_v47  ;;  %v371_v60 = vadd.s32 %v307_v52, %v175_v3  ;;  %vm439_vm5 = vcmp.eq.s32.totalorder %v2591_v46, %v2127_v7 }
  0x7c   :  { %v1622_v61 = vcvt.s32.f32 %v1558_v48  ;;  %v499_v62 = vsel %vm435_vm2, 1, %v2091_v13  ;;  %v503_v63 = vsel %vm439_vm5, 1, %v2091_v13  ;;  %vm631_vm6 = vcmp.eq.s32.totalorder %v2587_v43, %v2129_v8 }
  0x7d   :  { %v563_v4 = vadd.s32 %v499_v62, %v367_v56  ;;  %v567_v17 = vadd.s32 %v503_v63, %v371_v60  ;;  %vm635_vm7 = vcmp.eq.s32.totalorder %v2591_v46, %v2129_v8  ;;  %v695_v22 = vsel %vm631_vm6, 1, %v2091_v13 }
  0x7e   :  { %v1658_v23 = vpack.c.bf16 %v1622_v61, %v1618_v55  ;;  %v699_v31 = vsel %vm635_vm7, 1, %v2091_v13  ;;  %vm827_vm8 = vcmp.eq.s32.totalorder %v2587_v43, %v2131_v9  ;;  %vm831_vm9 = vcmp.eq.s32.totalorder %v2591_v46, %v2131_v9 }
  0x7f   :  { %v759_v32 = vadd.s32 %v695_v22, %v563_v4  ;;  %v763_v59 = vadd.s32 %v699_v31, %v567_v17  ;;  %v891_v39 = vsel %vm827_vm8, 1, %v2091_v13  ;;  %v895_v40 = vsel %vm831_vm9, 1, %v2091_v13 }
  0x80   :  { %1754 = vmatpush.bf16.msra.mxu3 %v1658_v23  ;;  %vm1023_vm10 = vcmp.eq.s32.totalorder %v2587_v43, %v2133_v10  ;;  %vm1027_vm11 = vcmp.eq.s32.totalorder %v2591_v46, %v2133_v10  ;;  %vm1219_vm12 = vcmp.eq.s32.totalorder %v2587_v43, %v2135_v11  ;;  %vm1223_vm13 = vcmp.eq.s32.totalorder %v2591_v46, %v2135_v11 }
  0x81   :  { %v955_v21 = vadd.s32 %v891_v39, %v759_v32  ;;  %v959_v41 = vadd.s32 %v895_v40, %v763_v59  ;;  %v1087_v42 = vsel %vm1023_vm10, 1, %v2091_v13  ;;  %v1091_v44 = vsel %vm1027_vm11, 1, %v2091_v13 }
  0x82   :  { %v1283_v45 = vsel %vm1219_vm12, 1, %v2091_v13  ;;  %v1287_v2 = vsel %vm1223_vm13, 1, %v2091_v13  ;;  %vm1415_vm14 = vcmp.eq.s32.totalorder %v2587_v43, %v2137_v12  ;;  %vm1419_vm15 = vcmp.eq.s32.totalorder %v2591_v46, %v2137_v12 }
  0x83   :  { %v1151_v27 = vadd.s32 %v1087_v42, %v955_v21  ;;  %v1155_v47 = vadd.s32 %v1091_v44, %v959_v41  ;;  %v1479_v48 = vsel %vm1415_vm14, 1, %v2091_v13  ;;  %v1483_v3 = vsel %vm1419_vm15, 1, %v2091_v13 }
  0x84   :  { %vm108_vm0 = vcmp.eq.s32.totalorder %v2587_v43, %v2185_v37  ;;  %vm112_vm1 = vcmp.eq.s32.totalorder %v2591_v46, %v2185_v37  ;;  %vm240_vm2 = vcmp.eq.s32.totalorder %v2587_v43, %v2187_v38  ;;  %vm244_vm3 = vcmp.eq.s32.totalorder %v2591_v46, %v2187_v38 }
  0x85   :  { %v1347_v51 = vadd.s32 %v1283_v45, %v1151_v27  ;;  %v1351_v52 = vadd.s32 %v1287_v2, %v1155_v47  ;;  %v172_v55 = vsel %vm108_vm0, 1, %v2091_v13  ;;  %v176_v56 = vsel %vm112_vm1, 1, %v2091_v13 }
  0x86   :  { %v304_v60 = vsel %vm240_vm2, 1, %v2091_v13  ;;  %v308_v61 = vsel %vm244_vm3, 1, %v2091_v13  ;;  %vm436_vm4 = vcmp.eq.s32.totalorder %v2587_v43, %v2203_v49  ;;  %vm440_vm5 = vcmp.eq.s32.totalorder %v2591_v46, %v2203_v49 }
  0x87   :  { %v1543_v62 = vadd.s32 %v1479_v48, %v1347_v51  ;;  %v1547_v63 = vadd.s32 %v1483_v3, %v1351_v52  ;;  %v368_v4 = vadd.s32 %v304_v60, %v172_v55  ;;  %v372_v17 = vadd.s32 %v308_v61, %v176_v56 }
  0x88   :  { %v500_v22 = vsel %vm436_vm4, 1, %v2091_v13  ;;  %v504_v23 = vsel %vm440_vm5, 1, %v2091_v13  ;;  %vm632_vm6 = vcmp.eq.s32.totalorder %v2587_v43, %v2205_v50  ;;  %vm636_vm7 = vcmp.eq.s32.totalorder %v2591_v46, %v2205_v50 }
  0x89   :  { %v1607_v31 = vcvt.s32.f32 %v1543_v62  ;;  %v1611_v32 = vcvt.s32.f32 %v1547_v63  ;;  %v564_v59 = vadd.s32 %v500_v22, %v368_v4  ;;  %v568_v39 = vadd.s32 %v504_v23, %v372_v17 }
  0x8a   :  { %v696_v40 = vsel %vm632_vm6, 1, %v2091_v13  ;;  %v700_v21 = vsel %vm636_vm7, 1, %v2091_v13  ;;  %vm828_vm8 = vcmp.eq.s32.totalorder %v2587_v43, %v2221_v14  ;;  %vm832_vm9 = vcmp.eq.s32.totalorder %v2591_v46, %v2221_v14 }
  0x8b   :  { %v1651_v41 = vpack.c.bf16 %v1611_v32, %v1607_v31  ;;  %v760_v42 = vadd.s32 %v696_v40, %v564_v59  ;;  %v764_v44 = vadd.s32 %v700_v21, %v568_v39  ;;  %v892_v45 = vsel %vm828_vm8, 1, %v2091_v13 }
  0x8c   :  { %v896_v2 = vsel %vm832_vm9, 1, %v2091_v13  ;;  %vm1024_vm10 = vcmp.eq.s32.totalorder %v2587_v43, %v2223_v15  ;;  %vm1028_vm11 = vcmp.eq.s32.totalorder %v2591_v46, %v2223_v15  ;;  %vm1220_vm12 = vcmp.eq.s32.totalorder %v2587_v43, %v2225_v16 }
  0x8d   :  { %1686 = vmatpush.bf16.msra.mxu0 %v1651_v41  ;;  %v956_v27 = vadd.s32 %v892_v45, %v760_v42  ;;  %v960_v47 = vadd.s32 %v896_v2, %v764_v44  ;;  %v1088_v48 = vsel %vm1024_vm10, 1, %v2091_v13  ;;  %v1092_v3 = vsel %vm1028_vm11, 1, %v2091_v13 }
  0x8e   :  { %vm1224_vm13 = vcmp.eq.s32.totalorder %v2591_v46, %v2225_v16  ;;  %v1284_v51 = vsel %vm1220_vm12, 1, %v2091_v13  ;;  %vm1416_vm14 = vcmp.eq.s32.totalorder %v2587_v43, %v2227_v19  ;;  %vm1420_vm15 = vcmp.eq.s32.totalorder %v2591_v46, %v2227_v19 }
  0x8f   :  { %v1152_v52 = vadd.s32 %v1088_v48, %v956_v27  ;;  %v1156_v55 = vadd.s32 %v1092_v3, %v960_v47  ;;  %v1288_v56 = vsel %vm1224_vm13, 1, %v2091_v13  ;;  %v1480_v60 = vsel %vm1416_vm14, 1, %v2091_v13 }
  0x90   :  { %v1484_v61 = vsel %vm1420_vm15, 1, %v2091_v13  ;;  %vm109_vm0 = vcmp.eq.s32.totalorder %v2587_v43, %v2230_v20  ;;  %vm113_vm1 = vcmp.eq.s32.totalorder %v2591_v46, %v2230_v20  ;;  %vm241_vm2 = vcmp.eq.s32.totalorder %v2587_v43, %v2261_v33 }
  0x91   :  { %v1348_v62 = vadd.s32 %v1284_v51, %v1152_v52  ;;  %v1352_v63 = vadd.s32 %v1288_v56, %v1156_v55  ;;  %v173_v4 = vsel %vm109_vm0, 1, %v2091_v13  ;;  %v177_v17 = vsel %vm113_vm1, 1, %v2091_v13 }
  0x92   :  { %vm245_vm3 = vcmp.eq.s32.totalorder %v2591_v46, %v2261_v33  ;;  %v305_v22 = vsel %vm241_vm2, 1, %v2091_v13  ;;  %vm437_vm4 = vcmp.eq.s32.totalorder %v2587_v43, %v2264_v34  ;;  %vm441_vm5 = vcmp.eq.s32.totalorder %v2591_v46, %v2264_v34 }
  0x93   :  { %v1544_v23 = vadd.s32 %v1480_v60, %v1348_v62  ;;  %v1548_v31 = vadd.s32 %v1484_v61, %v1352_v63  ;;  %v309_v32 = vsel %vm245_vm3, 1, %v2091_v13  ;;  %v369_v59 = vadd.s32 %v305_v22, %v173_v4 }
  0x94   :  { %v373_v39 = vadd.s32 %v309_v32, %v177_v17  ;;  %v501_v40 = vsel %vm437_vm4, 1, %v2091_v13  ;;  %v505_v21 = vsel %vm441_vm5, 1, %v2091_v13  ;;  %vm633_vm6 = vcmp.eq.s32.totalorder %v2587_v43, %v2281_v53 }
  0x95   :  { %v1608_v41 = vcvt.s32.f32 %v1544_v23  ;;  %v1612_v42 = vcvt.s32.f32 %v1548_v31  ;;  %v565_v44 = vadd.s32 %v501_v40, %v369_v59  ;;  %vm637_vm7 = vcmp.eq.s32.totalorder %v2591_v46, %v2281_v53 }
  0x96   :  { %v569_v45 = vadd.s32 %v505_v21, %v373_v39  ;;  %v697_v2 = vsel %vm633_vm6, 1, %v2091_v13  ;;  %v701_v27 = vsel %vm637_vm7, 1, %v2091_v13  ;;  %vm829_vm8 = vcmp.eq.s32.totalorder %v2587_v43, %v2284_v54 }
  0x97   :  { %v1652_v47 = vpack.c.bf16 %v1612_v42, %v1608_v41  ;;  %v761_v48 = vadd.s32 %v697_v2, %v565_v44  ;;  %vm833_vm9 = vcmp.eq.s32.totalorder %v2591_v46, %v2284_v54  ;;  %v893_v3 = vsel %vm829_vm8, 1, %v2091_v13 }
  0x98   :  { %v765_v51 = vadd.s32 %v701_v27, %v569_v45  ;;  %v897_v52 = vsel %vm833_vm9, 1, %v2091_v13  ;;  %vm1025_vm10 = vcmp.eq.s32.totalorder %v2587_v43, %v2287_v57  ;;  %vm1029_vm11 = vcmp.eq.s32.totalorder %v2591_v46, %v2287_v57 }
  0x99   :  { %1709 = vmatpush.bf16.msra.mxu1 %v1652_v47  ;;  %v957_v55 = vadd.s32 %v893_v3, %v761_v48  ;;  %v1089_v56 = vsel %vm1025_vm10, 1, %v2091_v13  ;;  %v1093_v60 = vsel %vm1029_vm11, 1, %v2091_v13  ;;  %vm1221_vm12 = vcmp.eq.s32.totalorder %v2587_v43, %v2290_v58 }
  0x9a   :  { %v961_v61 = vadd.s32 %v897_v52, %v765_v51  ;;  %vm1225_vm13 = vcmp.eq.s32.totalorder %v2591_v46, %v2290_v58  ;;  %v1285_v62 = vsel %vm1221_vm12, 1, %v2091_v13  ;;  %vm1417_vm14 = vcmp.eq.s32.totalorder %v2587_v43, %v2317_v28 }
  0x9b   :  { %v1153_v63 = vadd.s32 %v1089_v56, %v957_v55  ;;  %v1289_v4 = vsel %vm1225_vm13, 1, %v2091_v13  ;;  %vm1421_vm15 = vcmp.eq.s32.totalorder %v2591_v46, %v2317_v28  ;;  %v1481_v17 = vsel %vm1417_vm14, 1, %v2091_v13 }
  0x9c   :  { %v1157_v22 = vadd.s32 %v1093_v60, %v961_v61  ;;  %v1485_v23 = vsel %vm1421_vm15, 1, %v2091_v13  ;;  %vm110_vm0 = vcmp.eq.s32.totalorder %v2587_v43, %v2319_v29  ;;  %vm114_vm1 = vcmp.eq.s32.totalorder %v2591_v46, %v2319_v29 }
  0x9d   :  { %v1349_v31 = vadd.s32 %v1285_v62, %v1153_v63  ;;  %v174_v32 = vsel %vm110_vm0, 1, %v2091_v13  ;;  %v178_v59 = vsel %vm114_vm1, 1, %v2091_v13  ;;  %vm242_vm2 = vcmp.eq.s32.totalorder %v2587_v43, %v2321_v30 }
  0x9e   :  { %v1353_v39 = vadd.s32 %v1289_v4, %v1157_v22  ;;  %vm246_vm3 = vcmp.eq.s32.totalorder %v2591_v46, %v2321_v30  ;;  %v306_v40 = vsel %vm242_vm2, 1, %v2091_v13  ;;  %vm438_vm4 = vcmp.eq.s32.totalorder %v2587_v43, %v2323_v35 }
  0x9f   :  { %v1545_v21 = vadd.s32 %v1481_v17, %v1349_v31  ;;  %v310_v41 = vsel %vm246_vm3, 1, %v2091_v13  ;;  %v370_v42 = vadd.s32 %v306_v40, %v174_v32  ;;  %vm442_vm5 = vcmp.eq.s32.totalorder %v2591_v46, %v2323_v35 }
  0xa0   :  { %v1549_v44 = vadd.s32 %v1485_v23, %v1353_v39  ;;  %v374_v45 = vadd.s32 %v310_v41, %v178_v59  ;;  %v502_v2 = vsel %vm438_vm4, 1, %v2091_v13  ;;  %v506_v27 = vsel %vm442_vm5, 1, %v2091_v13 }
  0xa1   :  { %v1609_v47 = vcvt.s32.f32 %v1545_v21  ;;  %v566_v48 = vadd.s32 %v502_v2, %v370_v42  ;;  %vm634_vm6 = vcmp.eq.s32.totalorder %v2587_v43, %v2325_v36  ;;  %vm638_vm7 = vcmp.eq.s32.totalorder %v2591_v46, %v2325_v36 }
  0xa2   :  { %v1613_v3 = vcvt.s32.f32 %v1549_v44  ;;  %v570_v51 = vadd.s32 %v506_v27, %v374_v45  ;;  %v698_v52 = vsel %vm634_vm6, 1, %v2091_v13  ;;  %v702_v55 = vsel %vm638_vm7, 1, %v2091_v13 }
  0xa3   :  { %v762_v56 = vadd.s32 %v698_v52, %v566_v48  ;;  %vm830_vm8 = vcmp.eq.s32.totalorder %v2587_v43, %v2357_v18  ;;  %vm834_vm9 = vcmp.eq.s32.totalorder %v2591_v46, %v2357_v18  ;;  %vm1026_vm10 = vcmp.eq.s32.totalorder %v2587_v43, %v2359_v24 }
  0xa4   :  { %v1653_v60 = vpack.c.bf16 %v1613_v3, %v1609_v47  ;;  %v766_v61 = vadd.s32 %v702_v55, %v570_v51  ;;  %v894_v62 = vsel %vm830_vm8, 1, %v2091_v13  ;;  %v898_v63 = vsel %vm834_vm9, 1, %v2091_v13 }
  0xa5   :  { %v958_v4 = vadd.s32 %v894_v62, %v762_v56  ;;  %vm1030_vm11 = vcmp.eq.s32.totalorder %v2591_v46, %v2359_v24  ;;  %v1090_v17 = vsel %vm1026_vm10, 1, %v2091_v13  ;;  %vm1222_vm12 = vcmp.eq.s32.totalorder %v2587_v43, %v2361_v25 }
  0xa6   :  { %1732 = vmatpush.bf16.msra.mxu2 %v1653_v60  ;;  %v962_v22 = vadd.s32 %v898_v63, %v766_v61  ;;  %v1094_v23 = vsel %vm1030_vm11, 1, %v2091_v13  ;;  %vm1226_vm13 = vcmp.eq.s32.totalorder %v2591_v46, %v2361_v25  ;;  %v1286_v31 = vsel %vm1222_vm12, 1, %v2091_v13 }
  0xa7   :  { %v1154_v32 = vadd.s32 %v1090_v17, %v958_v4  ;;  %v1290_v59 = vsel %vm1226_vm13, 1, %v2091_v13  ;;  %vm1418_vm14 = vcmp.eq.s32.totalorder %v2587_v43, %v2367_v26  ;;  %vm1422_vm15 = vcmp.eq.s32.totalorder %v2591_v46, %v2367_v26 }
  0xa8   :  { %v1158_v39 = vadd.s32 %v1094_v23, %v962_v22  ;;  %v1482_v40 = vsel %vm1418_vm14, 1, %v2091_v13  ;;  %v2785_v21 = vadd.s32 64, %v2115_v1  ;;  %v1486_v42 = vsel %vm1422_vm15, 1, %v2091_v13 }
  0xa9   :  { %v1350_v41 = vadd.s32 %v1286_v31, %v1154_v32  ;;  %v2789_v44 = vadd.s32 72, %v2115_v1 }
  0xaa   :  { %v1354_v45 = vadd.s32 %v1290_v59, %v1158_v39  ;;  %vm99_vm0 = vcmp.eq.s32.totalorder %v2785_v21, %v2123_v5  ;;  %vm231_vm1 = vcmp.eq.s32.totalorder %v2785_v21, %v2125_v6  ;;  %vm427_vm2 = vcmp.eq.s32.totalorder %v2785_v21, %v2127_v7 }
  0xab   :  { %v1546_v43 = vadd.s32 %v1482_v40, %v1350_v41  ;;  %vm103_vm3 = vcmp.eq.s32.totalorder %v2789_v44, %v2123_v5  ;;  %v163_v46 = vsel %vm99_vm0, 1, %v2091_v13  ;;  %vm235_vm4 = vcmp.eq.s32.totalorder %v2789_v44, %v2125_v6 }
  0xac   :  { %v1550_v2 = vadd.s32 %v1486_v42, %v1354_v45  ;;  %v167_v27 = vsel %vm103_vm3, 1, %v2091_v13  ;;  %v295_v47 = vsel %vm231_vm1, 1, %v2091_v13  ;;  %v299_v48 = vsel %vm235_vm4, 1, %v2091_v13 }
  0xad   :  { %v1610_v3 = vcvt.s32.f32 %v1546_v43  ;;  %v359_v51 = vadd.s32 %v295_v47, %v163_v46  ;;  %v363_v52 = vadd.s32 %v299_v48, %v167_v27  ;;  %vm431_vm5 = vcmp.eq.s32.totalorder %v2789_v44, %v2127_v7 }
  0xae   :  { %v1614_v55 = vcvt.s32.f32 %v1550_v2  ;;  %v491_v56 = vsel %vm427_vm2, 1, %v2091_v13  ;;  %v495_v60 = vsel %vm431_vm5, 1, %v2091_v13  ;;  %vm623_vm6 = vcmp.eq.s32.totalorder %v2785_v21, %v2129_v8 }
  0xaf   :  { %v555_v61 = vadd.s32 %v491_v56, %v359_v51  ;;  %v559_v62 = vadd.s32 %v495_v60, %v363_v52  ;;  %vm627_vm7 = vcmp.eq.s32.totalorder %v2789_v44, %v2129_v8  ;;  %v687_v63 = vsel %vm623_vm6, 1, %v2091_v13 }
  0xb0   :  { %v1654_v4 = vpack.c.bf16 %v1614_v55, %v1610_v3  ;;  %v691_v17 = vsel %vm627_vm7, 1, %v2091_v13  ;;  %vm819_vm8 = vcmp.eq.s32.totalorder %v2785_v21, %v2131_v9  ;;  %vm823_vm9 = vcmp.eq.s32.totalorder %v2789_v44, %v2131_v9 }
  0xb1   :  { %v751_v22 = vadd.s32 %v687_v63, %v555_v61  ;;  %v755_v23 = vadd.s32 %v691_v17, %v559_v62  ;;  %v883_v31 = vsel %vm819_vm8, 1, %v2091_v13  ;;  %v887_v32 = vsel %vm823_vm9, 1, %v2091_v13 }
  0xb2   :  { %1755 = vmatpush.bf16.msra.mxu3 %v1654_v4  ;;  %vm1015_vm10 = vcmp.eq.s32.totalorder %v2785_v21, %v2133_v10  ;;  %vm1019_vm11 = vcmp.eq.s32.totalorder %v2789_v44, %v2133_v10  ;;  %vm1211_vm12 = vcmp.eq.s32.totalorder %v2785_v21, %v2135_v11  ;;  %vm1215_vm13 = vcmp.eq.s32.totalorder %v2789_v44, %v2135_v11 }
  0xb3   :  { %v947_v59 = vadd.s32 %v883_v31, %v751_v22  ;;  %v951_v39 = vadd.s32 %v887_v32, %v755_v23  ;;  %v1079_v40 = vsel %vm1015_vm10, 1, %v2091_v13  ;;  %v1083_v41 = vsel %vm1019_vm11, 1, %v2091_v13 }
  0xb4   :  { %v1275_v42 = vsel %vm1211_vm12, 1, %v2091_v13  ;;  %v1279_v45 = vsel %vm1215_vm13, 1, %v2091_v13  ;;  %vm1407_vm14 = vcmp.eq.s32.totalorder %v2785_v21, %v2137_v12  ;;  %vm1411_vm15 = vcmp.eq.s32.totalorder %v2789_v44, %v2137_v12 }
  0xb5   :  { %v1143_v43 = vadd.s32 %v1079_v40, %v947_v59  ;;  %v1147_v46 = vadd.s32 %v1083_v41, %v951_v39  ;;  %v1471_v2 = vsel %vm1407_vm14, 1, %v2091_v13  ;;  %v1475_v27 = vsel %vm1411_vm15, 1, %v2091_v13 }
  0xb6   :  { %vm100_vm0 = vcmp.eq.s32.totalorder %v2785_v21, %v2185_v37  ;;  %vm104_vm1 = vcmp.eq.s32.totalorder %v2789_v44, %v2185_v37  ;;  %vm232_vm2 = vcmp.eq.s32.totalorder %v2785_v21, %v2187_v38  ;;  %vm236_vm3 = vcmp.eq.s32.totalorder %v2789_v44, %v2187_v38 }
  0xb7   :  { %v1339_v47 = vadd.s32 %v1275_v42, %v1143_v43  ;;  %v1343_v48 = vadd.s32 %v1279_v45, %v1147_v46  ;;  %v164_v3 = vsel %vm100_vm0, 1, %v2091_v13  ;;  %v168_v51 = vsel %vm104_vm1, 1, %v2091_v13 }
  0xb8   :  { %v296_v52 = vsel %vm232_vm2, 1, %v2091_v13  ;;  %v300_v55 = vsel %vm236_vm3, 1, %v2091_v13  ;;  %vm428_vm4 = vcmp.eq.s32.totalorder %v2785_v21, %v2203_v49  ;;  %vm432_vm5 = vcmp.eq.s32.totalorder %v2789_v44, %v2203_v49 }
  0xb9   :  { %v1535_v56 = vadd.s32 %v1471_v2, %v1339_v47  ;;  %v1539_v60 = vadd.s32 %v1475_v27, %v1343_v48  ;;  %v360_v61 = vadd.s32 %v296_v52, %v164_v3  ;;  %v364_v62 = vadd.s32 %v300_v55, %v168_v51 }
  0xba   :  { %v492_v63 = vsel %vm428_vm4, 1, %v2091_v13  ;;  %v496_v4 = vsel %vm432_vm5, 1, %v2091_v13  ;;  %vm624_vm6 = vcmp.eq.s32.totalorder %v2785_v21, %v2205_v50  ;;  %vm628_vm7 = vcmp.eq.s32.totalorder %v2789_v44, %v2205_v50 }
  0xbb   :  { %v1599_v17 = vcvt.s32.f32 %v1535_v56  ;;  %v1603_v22 = vcvt.s32.f32 %v1539_v60  ;;  %v556_v23 = vadd.s32 %v492_v63, %v360_v61  ;;  %v560_v31 = vadd.s32 %v496_v4, %v364_v62 }
  0xbc   :  { %v688_v32 = vsel %vm624_vm6, 1, %v2091_v13  ;;  %v692_v59 = vsel %vm628_vm7, 1, %v2091_v13  ;;  %vm820_vm8 = vcmp.eq.s32.totalorder %v2785_v21, %v2221_v14  ;;  %vm824_vm9 = vcmp.eq.s32.totalorder %v2789_v44, %v2221_v14 }
  0xbd   :  { %v1647_v39 = vpack.c.bf16 %v1603_v22, %v1599_v17  ;;  %v752_v40 = vadd.s32 %v688_v32, %v556_v23  ;;  %v756_v41 = vadd.s32 %v692_v59, %v560_v31  ;;  %v884_v42 = vsel %vm820_vm8, 1, %v2091_v13 }
  0xbe   :  { %v888_v45 = vsel %vm824_vm9, 1, %v2091_v13  ;;  %vm1016_vm10 = vcmp.eq.s32.totalorder %v2785_v21, %v2223_v15  ;;  %vm1020_vm11 = vcmp.eq.s32.totalorder %v2789_v44, %v2223_v15  ;;  %vm1212_vm12 = vcmp.eq.s32.totalorder %v2785_v21, %v2225_v16 }
  0xbf   :  { %1687 = vmatpush.bf16.msra.mxu0 %v1647_v39  ;;  %v948_v43 = vadd.s32 %v884_v42, %v752_v40  ;;  %v952_v46 = vadd.s32 %v888_v45, %v756_v41  ;;  %v1080_v2 = vsel %vm1016_vm10, 1, %v2091_v13  ;;  %v1084_v27 = vsel %vm1020_vm11, 1, %v2091_v13 }
  0xc0   :  { %vm1216_vm13 = vcmp.eq.s32.totalorder %v2789_v44, %v2225_v16  ;;  %v1276_v47 = vsel %vm1212_vm12, 1, %v2091_v13  ;;  %vm1408_vm14 = vcmp.eq.s32.totalorder %v2785_v21, %v2227_v19  ;;  %vm1412_vm15 = vcmp.eq.s32.totalorder %v2789_v44, %v2227_v19 }
  0xc1   :  { %v1144_v48 = vadd.s32 %v1080_v2, %v948_v43  ;;  %v1148_v3 = vadd.s32 %v1084_v27, %v952_v46  ;;  %v1280_v51 = vsel %vm1216_vm13, 1, %v2091_v13  ;;  %v1472_v52 = vsel %vm1408_vm14, 1, %v2091_v13 }
  0xc2   :  { %v1476_v55 = vsel %vm1412_vm15, 1, %v2091_v13  ;;  %vm101_vm0 = vcmp.eq.s32.totalorder %v2785_v21, %v2230_v20  ;;  %vm105_vm1 = vcmp.eq.s32.totalorder %v2789_v44, %v2230_v20  ;;  %vm233_vm2 = vcmp.eq.s32.totalorder %v2785_v21, %v2261_v33 }
  0xc3   :  { %v1340_v56 = vadd.s32 %v1276_v47, %v1144_v48  ;;  %v1344_v60 = vadd.s32 %v1280_v51, %v1148_v3  ;;  %v165_v61 = vsel %vm101_vm0, 1, %v2091_v13  ;;  %v169_v62 = vsel %vm105_vm1, 1, %v2091_v13 }
  0xc4   :  { %vm237_vm3 = vcmp.eq.s32.totalorder %v2789_v44, %v2261_v33  ;;  %v297_v63 = vsel %vm233_vm2, 1, %v2091_v13  ;;  %vm429_vm4 = vcmp.eq.s32.totalorder %v2785_v21, %v2264_v34  ;;  %vm433_vm5 = vcmp.eq.s32.totalorder %v2789_v44, %v2264_v34 }
  0xc5   :  { %v1536_v4 = vadd.s32 %v1472_v52, %v1340_v56  ;;  %v1540_v17 = vadd.s32 %v1476_v55, %v1344_v60  ;;  %v301_v22 = vsel %vm237_vm3, 1, %v2091_v13  ;;  %v361_v23 = vadd.s32 %v297_v63, %v165_v61 }
  0xc6   :  { %v365_v31 = vadd.s32 %v301_v22, %v169_v62  ;;  %v493_v32 = vsel %vm429_vm4, 1, %v2091_v13  ;;  %v497_v59 = vsel %vm433_vm5, 1, %v2091_v13  ;;  %vm625_vm6 = vcmp.eq.s32.totalorder %v2785_v21, %v2281_v53 }
  0xc7   :  { %v1600_v39 = vcvt.s32.f32 %v1536_v4  ;;  %v1604_v40 = vcvt.s32.f32 %v1540_v17  ;;  %v557_v41 = vadd.s32 %v493_v32, %v361_v23  ;;  %vm629_vm7 = vcmp.eq.s32.totalorder %v2789_v44, %v2281_v53 }
  0xc8   :  { %v561_v42 = vadd.s32 %v497_v59, %v365_v31  ;;  %v689_v45 = vsel %vm625_vm6, 1, %v2091_v13  ;;  %v693_v43 = vsel %vm629_vm7, 1, %v2091_v13  ;;  %vm821_vm8 = vcmp.eq.s32.totalorder %v2785_v21, %v2284_v54 }
  0xc9   :  { %v1648_v46 = vpack.c.bf16 %v1604_v40, %v1600_v39  ;;  %v753_v2 = vadd.s32 %v689_v45, %v557_v41  ;;  %vm825_vm9 = vcmp.eq.s32.totalorder %v2789_v44, %v2284_v54  ;;  %v885_v27 = vsel %vm821_vm8, 1, %v2091_v13 }
  0xca   :  { %v757_v47 = vadd.s32 %v693_v43, %v561_v42  ;;  %v889_v48 = vsel %vm825_vm9, 1, %v2091_v13  ;;  %vm1017_vm10 = vcmp.eq.s32.totalorder %v2785_v21, %v2287_v57  ;;  %vm1021_vm11 = vcmp.eq.s32.totalorder %v2789_v44, %v2287_v57 }
  0xcb   :  { %1710 = vmatpush.bf16.msra.mxu1 %v1648_v46  ;;  %v949_v3 = vadd.s32 %v885_v27, %v753_v2  ;;  %v1081_v51 = vsel %vm1017_vm10, 1, %v2091_v13  ;;  %v1085_v52 = vsel %vm1021_vm11, 1, %v2091_v13  ;;  %vm1213_vm12 = vcmp.eq.s32.totalorder %v2785_v21, %v2290_v58 }
  0xcc   :  { %v953_v55 = vadd.s32 %v889_v48, %v757_v47  ;;  %vm1217_vm13 = vcmp.eq.s32.totalorder %v2789_v44, %v2290_v58  ;;  %v1277_v56 = vsel %vm1213_vm12, 1, %v2091_v13  ;;  %vm1409_vm14 = vcmp.eq.s32.totalorder %v2785_v21, %v2317_v28 }
  0xcd   :  { %v1145_v60 = vadd.s32 %v1081_v51, %v949_v3  ;;  %v1281_v61 = vsel %vm1217_vm13, 1, %v2091_v13  ;;  %vm1413_vm15 = vcmp.eq.s32.totalorder %v2789_v44, %v2317_v28  ;;  %v1473_v62 = vsel %vm1409_vm14, 1, %v2091_v13 }
  0xce   :  { %v1149_v63 = vadd.s32 %v1085_v52, %v953_v55  ;;  %v1477_v4 = vsel %vm1413_vm15, 1, %v2091_v13  ;;  %vm102_vm0 = vcmp.eq.s32.totalorder %v2785_v21, %v2319_v29  ;;  %vm106_vm1 = vcmp.eq.s32.totalorder %v2789_v44, %v2319_v29 }
  0xcf   :  { %v1341_v17 = vadd.s32 %v1277_v56, %v1145_v60  ;;  %v166_v22 = vsel %vm102_vm0, 1, %v2091_v13  ;;  %v170_v23 = vsel %vm106_vm1, 1, %v2091_v13  ;;  %vm234_vm2 = vcmp.eq.s32.totalorder %v2785_v21, %v2321_v30 }
  0xd0   :  { %v1345_v31 = vadd.s32 %v1281_v61, %v1149_v63  ;;  %vm238_vm3 = vcmp.eq.s32.totalorder %v2789_v44, %v2321_v30  ;;  %v298_v32 = vsel %vm234_vm2, 1, %v2091_v13  ;;  %vm430_vm4 = vcmp.eq.s32.totalorder %v2785_v21, %v2323_v35 }
  0xd1   :  { %v1537_v59 = vadd.s32 %v1473_v62, %v1341_v17  ;;  %v302_v39 = vsel %vm238_vm3, 1, %v2091_v13  ;;  %v362_v40 = vadd.s32 %v298_v32, %v166_v22  ;;  %vm434_vm5 = vcmp.eq.s32.totalorder %v2789_v44, %v2323_v35 }
  0xd2   :  { %v1541_v41 = vadd.s32 %v1477_v4, %v1345_v31  ;;  %v366_v42 = vadd.s32 %v302_v39, %v170_v23  ;;  %v494_v45 = vsel %vm430_vm4, 1, %v2091_v13  ;;  %v498_v43 = vsel %vm434_vm5, 1, %v2091_v13 }
  0xd3   :  { %v1601_v46 = vcvt.s32.f32 %v1537_v59  ;;  %v558_v2 = vadd.s32 %v494_v45, %v362_v40  ;;  %vm626_vm6 = vcmp.eq.s32.totalorder %v2785_v21, %v2325_v36  ;;  %vm630_vm7 = vcmp.eq.s32.totalorder %v2789_v44, %v2325_v36 }
  0xd4   :  { %v1605_v27 = vcvt.s32.f32 %v1541_v41  ;;  %v562_v47 = vadd.s32 %v498_v43, %v366_v42  ;;  %v690_v48 = vsel %vm626_vm6, 1, %v2091_v13  ;;  %v694_v3 = vsel %vm630_vm7, 1, %v2091_v13 }
  0xd5   :  { %v754_v51 = vadd.s32 %v690_v48, %v558_v2  ;;  %vm822_vm8 = vcmp.eq.s32.totalorder %v2785_v21, %v2357_v18  ;;  %vm826_vm9 = vcmp.eq.s32.totalorder %v2789_v44, %v2357_v18  ;;  %vm1018_vm10 = vcmp.eq.s32.totalorder %v2785_v21, %v2359_v24 }
  0xd6   :  { %v1649_v52 = vpack.c.bf16 %v1605_v27, %v1601_v46  ;;  %v758_v55 = vadd.s32 %v694_v3, %v562_v47  ;;  %v886_v56 = vsel %vm822_vm8, 1, %v2091_v13  ;;  %v890_v60 = vsel %vm826_vm9, 1, %v2091_v13 }
  0xd7   :  { %v950_v61 = vadd.s32 %v886_v56, %v754_v51  ;;  %vm1022_vm11 = vcmp.eq.s32.totalorder %v2789_v44, %v2359_v24  ;;  %v1082_v62 = vsel %vm1018_vm10, 1, %v2091_v13  ;;  %vm1214_vm12 = vcmp.eq.s32.totalorder %v2785_v21, %v2361_v25 }
  0xd8   :  { %1733 = vmatpush.bf16.msra.mxu2 %v1649_v52  ;;  %v954_v63 = vadd.s32 %v890_v60, %v758_v55  ;;  %v1086_v4 = vsel %vm1022_vm11, 1, %v2091_v13  ;;  %vm1218_vm13 = vcmp.eq.s32.totalorder %v2789_v44, %v2361_v25  ;;  %v1278_v17 = vsel %vm1214_vm12, 1, %v2091_v13 }
  0xd9   :  { %v1146_v22 = vadd.s32 %v1082_v62, %v950_v61  ;;  %v1282_v23 = vsel %vm1218_vm13, 1, %v2091_v13  ;;  %vm1410_vm14 = vcmp.eq.s32.totalorder %v2785_v21, %v2367_v26  ;;  %vm1414_vm15 = vcmp.eq.s32.totalorder %v2789_v44, %v2367_v26 }
  0xda   :  { %v1150_v31 = vadd.s32 %v1086_v4, %v954_v63  ;;  %v1474_v32 = vsel %vm1410_vm14, 1, %v2091_v13  ;;  %v2983_v59 = vadd.s32 48, %v2115_v1  ;;  %v1478_v40 = vsel %vm1414_vm15, 1, %v2091_v13 }
  0xdb   :  { %v1342_v39 = vadd.s32 %v1278_v17, %v1146_v22  ;;  %v2987_v41 = vadd.s32 56, %v2115_v1 }
  0xdc   :  { %v1346_v42 = vadd.s32 %v1282_v23, %v1150_v31  ;;  %vm91_vm0 = vcmp.eq.s32.totalorder %v2983_v59, %v2123_v5  ;;  %vm223_vm1 = vcmp.eq.s32.totalorder %v2983_v59, %v2125_v6  ;;  %vm419_vm2 = vcmp.eq.s32.totalorder %v2983_v59, %v2127_v7 }
  0xdd   :  { %v1538_v21 = vadd.s32 %v1474_v32, %v1342_v39  ;;  %vm95_vm3 = vcmp.eq.s32.totalorder %v2987_v41, %v2123_v5  ;;  %v155_v44 = vsel %vm91_vm0, 1, %v2091_v13  ;;  %vm227_vm4 = vcmp.eq.s32.totalorder %v2987_v41, %v2125_v6 }
  0xde   :  { %v1542_v45 = vadd.s32 %v1478_v40, %v1346_v42  ;;  %v159_v43 = vsel %vm95_vm3, 1, %v2091_v13  ;;  %v287_v46 = vsel %vm223_vm1, 1, %v2091_v13  ;;  %v291_v2 = vsel %vm227_vm4, 1, %v2091_v13 }
  0xdf   :  { %v1602_v27 = vcvt.s32.f32 %v1538_v21  ;;  %v351_v47 = vadd.s32 %v287_v46, %v155_v44  ;;  %v355_v48 = vadd.s32 %v291_v2, %v159_v43  ;;  %vm423_vm5 = vcmp.eq.s32.totalorder %v2987_v41, %v2127_v7 }
  0xe0   :  { %v1606_v3 = vcvt.s32.f32 %v1542_v45  ;;  %v483_v51 = vsel %vm419_vm2, 1, %v2091_v13  ;;  %v487_v52 = vsel %vm423_vm5, 1, %v2091_v13  ;;  %vm615_vm6 = vcmp.eq.s32.totalorder %v2983_v59, %v2129_v8 }
  0xe1   :  { %v547_v55 = vadd.s32 %v483_v51, %v351_v47  ;;  %v551_v56 = vadd.s32 %v487_v52, %v355_v48  ;;  %vm619_vm7 = vcmp.eq.s32.totalorder %v2987_v41, %v2129_v8  ;;  %v679_v60 = vsel %vm615_vm6, 1, %v2091_v13 }
  0xe2   :  { %v1650_v61 = vpack.c.bf16 %v1606_v3, %v1602_v27  ;;  %v683_v62 = vsel %vm619_vm7, 1, %v2091_v13  ;;  %vm811_vm8 = vcmp.eq.s32.totalorder %v2983_v59, %v2131_v9  ;;  %vm815_vm9 = vcmp.eq.s32.totalorder %v2987_v41, %v2131_v9 }
  0xe3   :  { %v743_v63 = vadd.s32 %v679_v60, %v547_v55  ;;  %v747_v4 = vadd.s32 %v683_v62, %v551_v56  ;;  %v875_v17 = vsel %vm811_vm8, 1, %v2091_v13  ;;  %v879_v22 = vsel %vm815_vm9, 1, %v2091_v13 }
  0xe4   :  { %1756 = vmatpush.bf16.msra.mxu3 %v1650_v61  ;;  %vm1007_vm10 = vcmp.eq.s32.totalorder %v2983_v59, %v2133_v10  ;;  %vm1011_vm11 = vcmp.eq.s32.totalorder %v2987_v41, %v2133_v10  ;;  %vm1203_vm12 = vcmp.eq.s32.totalorder %v2983_v59, %v2135_v11  ;;  %vm1207_vm13 = vcmp.eq.s32.totalorder %v2987_v41, %v2135_v11 }
  0xe5   :  { %v939_v23 = vadd.s32 %v875_v17, %v743_v63  ;;  %v943_v31 = vadd.s32 %v879_v22, %v747_v4  ;;  %v1071_v32 = vsel %vm1007_vm10, 1, %v2091_v13  ;;  %v1075_v39 = vsel %vm1011_vm11, 1, %v2091_v13 }
  0xe6   :  { %v1267_v40 = vsel %vm1203_vm12, 1, %v2091_v13  ;;  %v1271_v42 = vsel %vm1207_vm13, 1, %v2091_v13  ;;  %vm1399_vm14 = vcmp.eq.s32.totalorder %v2983_v59, %v2137_v12  ;;  %vm1403_vm15 = vcmp.eq.s32.totalorder %v2987_v41, %v2137_v12 }
  0xe7   :  { %v1135_v21 = vadd.s32 %v1071_v32, %v939_v23  ;;  %v1139_v44 = vadd.s32 %v1075_v39, %v943_v31  ;;  %v1463_v45 = vsel %vm1399_vm14, 1, %v2091_v13  ;;  %v1467_v43 = vsel %vm1403_vm15, 1, %v2091_v13 }
  0xe8   :  { %vm92_vm0 = vcmp.eq.s32.totalorder %v2983_v59, %v2185_v37  ;;  %vm96_vm1 = vcmp.eq.s32.totalorder %v2987_v41, %v2185_v37  ;;  %vm224_vm2 = vcmp.eq.s32.totalorder %v2983_v59, %v2187_v38  ;;  %vm228_vm3 = vcmp.eq.s32.totalorder %v2987_v41, %v2187_v38 }
  0xe9   :  { %v1331_v46 = vadd.s32 %v1267_v40, %v1135_v21  ;;  %v1335_v2 = vadd.s32 %v1271_v42, %v1139_v44  ;;  %v156_v27 = vsel %vm92_vm0, 1, %v2091_v13  ;;  %v160_v47 = vsel %vm96_vm1, 1, %v2091_v13 }
  0xea   :  { %v288_v48 = vsel %vm224_vm2, 1, %v2091_v13  ;;  %v292_v3 = vsel %vm228_vm3, 1, %v2091_v13  ;;  %vm420_vm4 = vcmp.eq.s32.totalorder %v2983_v59, %v2203_v49  ;;  %vm424_vm5 = vcmp.eq.s32.totalorder %v2987_v41, %v2203_v49 }
  0xeb   :  { %v1527_v51 = vadd.s32 %v1463_v45, %v1331_v46  ;;  %v1531_v52 = vadd.s32 %v1467_v43, %v1335_v2  ;;  %v352_v55 = vadd.s32 %v288_v48, %v156_v27  ;;  %v356_v56 = vadd.s32 %v292_v3, %v160_v47 }
  0xec   :  { %v484_v60 = vsel %vm420_vm4, 1, %v2091_v13  ;;  %v488_v61 = vsel %vm424_vm5, 1, %v2091_v13  ;;  %vm616_vm6 = vcmp.eq.s32.totalorder %v2983_v59, %v2205_v50  ;;  %vm620_vm7 = vcmp.eq.s32.totalorder %v2987_v41, %v2205_v50 }
  0xed   :  { %v1591_v62 = vcvt.s32.f32 %v1527_v51  ;;  %v1595_v63 = vcvt.s32.f32 %v1531_v52  ;;  %v548_v4 = vadd.s32 %v484_v60, %v352_v55  ;;  %v552_v17 = vadd.s32 %v488_v61, %v356_v56 }
  0xee   :  { %v680_v22 = vsel %vm616_vm6, 1, %v2091_v13  ;;  %v684_v23 = vsel %vm620_vm7, 1, %v2091_v13  ;;  %vm812_vm8 = vcmp.eq.s32.totalorder %v2983_v59, %v2221_v14  ;;  %vm816_vm9 = vcmp.eq.s32.totalorder %v2987_v41, %v2221_v14 }
  0xef   :  { %v1643_v31 = vpack.c.bf16 %v1595_v63, %v1591_v62  ;;  %v744_v32 = vadd.s32 %v680_v22, %v548_v4  ;;  %v748_v39 = vadd.s32 %v684_v23, %v552_v17  ;;  %v876_v40 = vsel %vm812_vm8, 1, %v2091_v13 }
  0xf0   :  { %v880_v42 = vsel %vm816_vm9, 1, %v2091_v13  ;;  %vm1008_vm10 = vcmp.eq.s32.totalorder %v2983_v59, %v2223_v15  ;;  %vm1012_vm11 = vcmp.eq.s32.totalorder %v2987_v41, %v2223_v15  ;;  %vm1204_vm12 = vcmp.eq.s32.totalorder %v2983_v59, %v2225_v16 }
  0xf1   :  { %1688 = vmatpush.bf16.msra.mxu0 %v1643_v31  ;;  %v940_v21 = vadd.s32 %v876_v40, %v744_v32  ;;  %v944_v44 = vadd.s32 %v880_v42, %v748_v39  ;;  %v1072_v45 = vsel %vm1008_vm10, 1, %v2091_v13  ;;  %v1076_v43 = vsel %vm1012_vm11, 1, %v2091_v13 }
  0xf2   :  { %vm1208_vm13 = vcmp.eq.s32.totalorder %v2987_v41, %v2225_v16  ;;  %v1268_v46 = vsel %vm1204_vm12, 1, %v2091_v13  ;;  %vm1400_vm14 = vcmp.eq.s32.totalorder %v2983_v59, %v2227_v19  ;;  %vm1404_vm15 = vcmp.eq.s32.totalorder %v2987_v41, %v2227_v19 }
  0xf3   :  { %v1136_v2 = vadd.s32 %v1072_v45, %v940_v21  ;;  %v1140_v27 = vadd.s32 %v1076_v43, %v944_v44  ;;  %v1272_v47 = vsel %vm1208_vm13, 1, %v2091_v13  ;;  %v1464_v48 = vsel %vm1400_vm14, 1, %v2091_v13 }
  0xf4   :  { %v1468_v3 = vsel %vm1404_vm15, 1, %v2091_v13  ;;  %vm93_vm0 = vcmp.eq.s32.totalorder %v2983_v59, %v2230_v20  ;;  %vm97_vm1 = vcmp.eq.s32.totalorder %v2987_v41, %v2230_v20  ;;  %vm225_vm2 = vcmp.eq.s32.totalorder %v2983_v59, %v2261_v33 }
  0xf5   :  { %v1332_v51 = vadd.s32 %v1268_v46, %v1136_v2  ;;  %v1336_v52 = vadd.s32 %v1272_v47, %v1140_v27  ;;  %v157_v55 = vsel %vm93_vm0, 1, %v2091_v13  ;;  %v161_v56 = vsel %vm97_vm1, 1, %v2091_v13 }
  0xf6   :  { %vm229_vm3 = vcmp.eq.s32.totalorder %v2987_v41, %v2261_v33  ;;  %v289_v60 = vsel %vm225_vm2, 1, %v2091_v13  ;;  %vm421_vm4 = vcmp.eq.s32.totalorder %v2983_v59, %v2264_v34  ;;  %vm425_vm5 = vcmp.eq.s32.totalorder %v2987_v41, %v2264_v34 }
  0xf7   :  { %v1528_v61 = vadd.s32 %v1464_v48, %v1332_v51  ;;  %v1532_v62 = vadd.s32 %v1468_v3, %v1336_v52  ;;  %v293_v63 = vsel %vm229_vm3, 1, %v2091_v13  ;;  %v353_v4 = vadd.s32 %v289_v60, %v157_v55 }
  0xf8   :  { %v357_v17 = vadd.s32 %v293_v63, %v161_v56  ;;  %v485_v22 = vsel %vm421_vm4, 1, %v2091_v13  ;;  %v489_v23 = vsel %vm425_vm5, 1, %v2091_v13  ;;  %vm617_vm6 = vcmp.eq.s32.totalorder %v2983_v59, %v2281_v53 }
  0xf9   :  { %v1592_v31 = vcvt.s32.f32 %v1528_v61  ;;  %v1596_v32 = vcvt.s32.f32 %v1532_v62  ;;  %v549_v39 = vadd.s32 %v485_v22, %v353_v4  ;;  %vm621_vm7 = vcmp.eq.s32.totalorder %v2987_v41, %v2281_v53 }
  0xfa   :  { %v553_v40 = vadd.s32 %v489_v23, %v357_v17  ;;  %v681_v42 = vsel %vm617_vm6, 1, %v2091_v13  ;;  %v685_v21 = vsel %vm621_vm7, 1, %v2091_v13  ;;  %vm813_vm8 = vcmp.eq.s32.totalorder %v2983_v59, %v2284_v54 }
  0xfb   :  { %v1644_v44 = vpack.c.bf16 %v1596_v32, %v1592_v31  ;;  %v745_v45 = vadd.s32 %v681_v42, %v549_v39  ;;  %vm817_vm9 = vcmp.eq.s32.totalorder %v2987_v41, %v2284_v54  ;;  %v877_v43 = vsel %vm813_vm8, 1, %v2091_v13 }
  0xfc   :  { %v749_v46 = vadd.s32 %v685_v21, %v553_v40  ;;  %v881_v2 = vsel %vm817_vm9, 1, %v2091_v13  ;;  %vm1009_vm10 = vcmp.eq.s32.totalorder %v2983_v59, %v2287_v57  ;;  %vm1013_vm11 = vcmp.eq.s32.totalorder %v2987_v41, %v2287_v57 }
  0xfd   :  { %1711 = vmatpush.bf16.msra.mxu1 %v1644_v44  ;;  %v941_v27 = vadd.s32 %v877_v43, %v745_v45  ;;  %v1073_v47 = vsel %vm1009_vm10, 1, %v2091_v13  ;;  %v1077_v48 = vsel %vm1013_vm11, 1, %v2091_v13  ;;  %vm1205_vm12 = vcmp.eq.s32.totalorder %v2983_v59, %v2290_v58 }
  0xfe   :  { %v945_v3 = vadd.s32 %v881_v2, %v749_v46  ;;  %vm1209_vm13 = vcmp.eq.s32.totalorder %v2987_v41, %v2290_v58  ;;  %v1269_v51 = vsel %vm1205_vm12, 1, %v2091_v13  ;;  %vm1401_vm14 = vcmp.eq.s32.totalorder %v2983_v59, %v2317_v28 }
  0xff   :  { %v1137_v52 = vadd.s32 %v1073_v47, %v941_v27  ;;  %v1273_v55 = vsel %vm1209_vm13, 1, %v2091_v13  ;;  %vm1405_vm15 = vcmp.eq.s32.totalorder %v2987_v41, %v2317_v28  ;;  %v1465_v56 = vsel %vm1401_vm14, 1, %v2091_v13 }
 0x100   :  { %v1141_v60 = vadd.s32 %v1077_v48, %v945_v3  ;;  %v1469_v61 = vsel %vm1405_vm15, 1, %v2091_v13  ;;  %vm94_vm0 = vcmp.eq.s32.totalorder %v2983_v59, %v2319_v29  ;;  %vm98_vm1 = vcmp.eq.s32.totalorder %v2987_v41, %v2319_v29 }
 0x101   :  { %v1333_v62 = vadd.s32 %v1269_v51, %v1137_v52  ;;  %v158_v63 = vsel %vm94_vm0, 1, %v2091_v13  ;;  %v162_v4 = vsel %vm98_vm1, 1, %v2091_v13  ;;  %vm226_vm2 = vcmp.eq.s32.totalorder %v2983_v59, %v2321_v30 }
 0x102   :  { %v1337_v17 = vadd.s32 %v1273_v55, %v1141_v60  ;;  %vm230_vm3 = vcmp.eq.s32.totalorder %v2987_v41, %v2321_v30  ;;  %v290_v22 = vsel %vm226_vm2, 1, %v2091_v13  ;;  %vm422_vm4 = vcmp.eq.s32.totalorder %v2983_v59, %v2323_v35 }
 0x103   :  { %v1529_v23 = vadd.s32 %v1465_v56, %v1333_v62  ;;  %v294_v31 = vsel %vm230_vm3, 1, %v2091_v13  ;;  %v354_v32 = vadd.s32 %v290_v22, %v158_v63  ;;  %vm426_vm5 = vcmp.eq.s32.totalorder %v2987_v41, %v2323_v35 }
 0x104   :  { %v1533_v39 = vadd.s32 %v1469_v61, %v1337_v17  ;;  %v358_v40 = vadd.s32 %v294_v31, %v162_v4  ;;  %v486_v42 = vsel %vm422_vm4, 1, %v2091_v13  ;;  %v490_v21 = vsel %vm426_vm5, 1, %v2091_v13 }
 0x105   :  { %v1593_v44 = vcvt.s32.f32 %v1529_v23  ;;  %v550_v45 = vadd.s32 %v486_v42, %v354_v32  ;;  %vm618_vm6 = vcmp.eq.s32.totalorder %v2983_v59, %v2325_v36  ;;  %vm622_vm7 = vcmp.eq.s32.totalorder %v2987_v41, %v2325_v36 }
 0x106   :  { %v1597_v43 = vcvt.s32.f32 %v1533_v39  ;;  %v554_v46 = vadd.s32 %v490_v21, %v358_v40  ;;  %v682_v2 = vsel %vm618_vm6, 1, %v2091_v13  ;;  %v686_v27 = vsel %vm622_vm7, 1, %v2091_v13 }
 0x107   :  { %v746_v47 = vadd.s32 %v682_v2, %v550_v45  ;;  %vm814_vm8 = vcmp.eq.s32.totalorder %v2983_v59, %v2357_v18  ;;  %vm818_vm9 = vcmp.eq.s32.totalorder %v2987_v41, %v2357_v18  ;;  %vm1010_vm10 = vcmp.eq.s32.totalorder %v2983_v59, %v2359_v24 }
 0x108   :  { %v1645_v48 = vpack.c.bf16 %v1597_v43, %v1593_v44  ;;  %v750_v3 = vadd.s32 %v686_v27, %v554_v46  ;;  %v878_v51 = vsel %vm814_vm8, 1, %v2091_v13  ;;  %v882_v52 = vsel %vm818_vm9, 1, %v2091_v13 }
 0x109   :  { %v942_v55 = vadd.s32 %v878_v51, %v746_v47  ;;  %vm1014_vm11 = vcmp.eq.s32.totalorder %v2987_v41, %v2359_v24  ;;  %v1074_v56 = vsel %vm1010_vm10, 1, %v2091_v13  ;;  %vm1206_vm12 = vcmp.eq.s32.totalorder %v2983_v59, %v2361_v25 }
 0x10a   :  { %1734 = vmatpush.bf16.msra.mxu2 %v1645_v48  ;;  %v946_v60 = vadd.s32 %v882_v52, %v750_v3  ;;  %v1078_v61 = vsel %vm1014_vm11, 1, %v2091_v13  ;;  %vm1210_vm13 = vcmp.eq.s32.totalorder %v2987_v41, %v2361_v25  ;;  %v1270_v62 = vsel %vm1206_vm12, 1, %v2091_v13 }
 0x10b   :  { %v1138_v63 = vadd.s32 %v1074_v56, %v942_v55  ;;  %v1274_v4 = vsel %vm1210_vm13, 1, %v2091_v13  ;;  %vm1402_vm14 = vcmp.eq.s32.totalorder %v2983_v59, %v2367_v26  ;;  %vm1406_vm15 = vcmp.eq.s32.totalorder %v2987_v41, %v2367_v26 }
 0x10c   :  { %v1142_v17 = vadd.s32 %v1078_v61, %v946_v60  ;;  %v1466_v22 = vsel %vm1402_vm14, 1, %v2091_v13  ;;  %v3181_v23 = vadd.s32 32, %v2115_v1  ;;  %v1470_v32 = vsel %vm1406_vm15, 1, %v2091_v13 }
 0x10d   :  { %v1334_v31 = vadd.s32 %v1270_v62, %v1138_v63  ;;  %v3185_v39 = vadd.s32 40, %v2115_v1 }
 0x10e   :  { %v1338_v40 = vadd.s32 %v1274_v4, %v1142_v17  ;;  %vm83_vm0 = vcmp.eq.s32.totalorder %v3181_v23, %v2123_v5  ;;  %vm215_vm1 = vcmp.eq.s32.totalorder %v3181_v23, %v2125_v6  ;;  %vm411_vm2 = vcmp.eq.s32.totalorder %v3181_v23, %v2127_v7 }
 0x10f   :  { %v1530_v59 = vadd.s32 %v1466_v22, %v1334_v31  ;;  %vm87_vm3 = vcmp.eq.s32.totalorder %v3185_v39, %v2123_v5  ;;  %v147_v41 = vsel %vm83_vm0, 1, %v2091_v13  ;;  %vm219_vm4 = vcmp.eq.s32.totalorder %v3185_v39, %v2125_v6 }
 0x110   :  { %v1534_v42 = vadd.s32 %v1470_v32, %v1338_v40  ;;  %v151_v21 = vsel %vm87_vm3, 1, %v2091_v13  ;;  %v279_v44 = vsel %vm215_vm1, 1, %v2091_v13  ;;  %v283_v45 = vsel %vm219_vm4, 1, %v2091_v13 }
 0x111   :  { %v1594_v43 = vcvt.s32.f32 %v1530_v59  ;;  %v343_v46 = vadd.s32 %v279_v44, %v147_v41  ;;  %v347_v2 = vadd.s32 %v283_v45, %v151_v21  ;;  %vm415_vm5 = vcmp.eq.s32.totalorder %v3185_v39, %v2127_v7 }
 0x112   :  { %v1598_v27 = vcvt.s32.f32 %v1534_v42  ;;  %v475_v47 = vsel %vm411_vm2, 1, %v2091_v13  ;;  %v479_v48 = vsel %vm415_vm5, 1, %v2091_v13  ;;  %vm607_vm6 = vcmp.eq.s32.totalorder %v3181_v23, %v2129_v8 }
 0x113   :  { %v539_v3 = vadd.s32 %v475_v47, %v343_v46  ;;  %v543_v51 = vadd.s32 %v479_v48, %v347_v2  ;;  %vm611_vm7 = vcmp.eq.s32.totalorder %v3185_v39, %v2129_v8  ;;  %v671_v52 = vsel %vm607_vm6, 1, %v2091_v13 }
 0x114   :  { %v1646_v55 = vpack.c.bf16 %v1598_v27, %v1594_v43  ;;  %v675_v56 = vsel %vm611_vm7, 1, %v2091_v13  ;;  %vm803_vm8 = vcmp.eq.s32.totalorder %v3181_v23, %v2131_v9  ;;  %vm807_vm9 = vcmp.eq.s32.totalorder %v3185_v39, %v2131_v9 }
 0x115   :  { %v735_v60 = vadd.s32 %v671_v52, %v539_v3  ;;  %v739_v61 = vadd.s32 %v675_v56, %v543_v51  ;;  %v867_v62 = vsel %vm803_vm8, 1, %v2091_v13  ;;  %v871_v63 = vsel %vm807_vm9, 1, %v2091_v13 }
 0x116   :  { %1757 = vmatpush.bf16.msra.mxu3 %v1646_v55  ;;  %vm999_vm10 = vcmp.eq.s32.totalorder %v3181_v23, %v2133_v10  ;;  %vm1003_vm11 = vcmp.eq.s32.totalorder %v3185_v39, %v2133_v10  ;;  %vm1195_vm12 = vcmp.eq.s32.totalorder %v3181_v23, %v2135_v11  ;;  %vm1199_vm13 = vcmp.eq.s32.totalorder %v3185_v39, %v2135_v11 }
 0x117   :  { %v931_v4 = vadd.s32 %v867_v62, %v735_v60  ;;  %v935_v17 = vadd.s32 %v871_v63, %v739_v61  ;;  %v1063_v22 = vsel %vm999_vm10, 1, %v2091_v13  ;;  %v1067_v31 = vsel %vm1003_vm11, 1, %v2091_v13 }
 0x118   :  { %v1259_v32 = vsel %vm1195_vm12, 1, %v2091_v13  ;;  %v1263_v40 = vsel %vm1199_vm13, 1, %v2091_v13  ;;  %vm1391_vm14 = vcmp.eq.s32.totalorder %v3181_v23, %v2137_v12  ;;  %vm1395_vm15 = vcmp.eq.s32.totalorder %v3185_v39, %v2137_v12 }
 0x119   :  { %v1127_v59 = vadd.s32 %v1063_v22, %v931_v4  ;;  %v1131_v41 = vadd.s32 %v1067_v31, %v935_v17  ;;  %v1455_v42 = vsel %vm1391_vm14, 1, %v2091_v13  ;;  %v1459_v21 = vsel %vm1395_vm15, 1, %v2091_v13 }
 0x11a   :  { %vm84_vm0 = vcmp.eq.s32.totalorder %v3181_v23, %v2185_v37  ;;  %vm88_vm1 = vcmp.eq.s32.totalorder %v3185_v39, %v2185_v37  ;;  %vm216_vm2 = vcmp.eq.s32.totalorder %v3181_v23, %v2187_v38  ;;  %vm220_vm3 = vcmp.eq.s32.totalorder %v3185_v39, %v2187_v38 }
 0x11b   :  { %v1323_v44 = vadd.s32 %v1259_v32, %v1127_v59  ;;  %v1327_v45 = vadd.s32 %v1263_v40, %v1131_v41  ;;  %v148_v43 = vsel %vm84_vm0, 1, %v2091_v13  ;;  %v152_v46 = vsel %vm88_vm1, 1, %v2091_v13 }
 0x11c   :  { %v280_v2 = vsel %vm216_vm2, 1, %v2091_v13  ;;  %v284_v27 = vsel %vm220_vm3, 1, %v2091_v13  ;;  %vm412_vm4 = vcmp.eq.s32.totalorder %v3181_v23, %v2203_v49  ;;  %vm416_vm5 = vcmp.eq.s32.totalorder %v3185_v39, %v2203_v49 }
 0x11d   :  { %v1519_v47 = vadd.s32 %v1455_v42, %v1323_v44  ;;  %v1523_v48 = vadd.s32 %v1459_v21, %v1327_v45  ;;  %v344_v3 = vadd.s32 %v280_v2, %v148_v43  ;;  %v348_v51 = vadd.s32 %v284_v27, %v152_v46 }
 0x11e   :  { %v476_v52 = vsel %vm412_vm4, 1, %v2091_v13  ;;  %v480_v55 = vsel %vm416_vm5, 1, %v2091_v13  ;;  %vm608_vm6 = vcmp.eq.s32.totalorder %v3181_v23, %v2205_v50  ;;  %vm612_vm7 = vcmp.eq.s32.totalorder %v3185_v39, %v2205_v50 }
 0x11f   :  { %v1583_v56 = vcvt.s32.f32 %v1519_v47  ;;  %v1587_v60 = vcvt.s32.f32 %v1523_v48  ;;  %v540_v61 = vadd.s32 %v476_v52, %v344_v3  ;;  %v544_v62 = vadd.s32 %v480_v55, %v348_v51 }
 0x120   :  { %v672_v63 = vsel %vm608_vm6, 1, %v2091_v13  ;;  %v676_v4 = vsel %vm612_vm7, 1, %v2091_v13  ;;  %vm804_vm8 = vcmp.eq.s32.totalorder %v3181_v23, %v2221_v14  ;;  %vm808_vm9 = vcmp.eq.s32.totalorder %v3185_v39, %v2221_v14 }
 0x121   :  { %v1639_v17 = vpack.c.bf16 %v1587_v60, %v1583_v56  ;;  %v736_v22 = vadd.s32 %v672_v63, %v540_v61  ;;  %v740_v31 = vadd.s32 %v676_v4, %v544_v62  ;;  %v868_v32 = vsel %vm804_vm8, 1, %v2091_v13 }
 0x122   :  { %v872_v40 = vsel %vm808_vm9, 1, %v2091_v13  ;;  %vm1000_vm10 = vcmp.eq.s32.totalorder %v3181_v23, %v2223_v15  ;;  %vm1004_vm11 = vcmp.eq.s32.totalorder %v3185_v39, %v2223_v15  ;;  %vm1196_vm12 = vcmp.eq.s32.totalorder %v3181_v23, %v2225_v16 }
 0x123   :  { %1689 = vmatpush.bf16.msra.mxu0 %v1639_v17  ;;  %v932_v59 = vadd.s32 %v868_v32, %v736_v22  ;;  %v936_v41 = vadd.s32 %v872_v40, %v740_v31  ;;  %v1064_v42 = vsel %vm1000_vm10, 1, %v2091_v13  ;;  %v1068_v21 = vsel %vm1004_vm11, 1, %v2091_v13 }
 0x124   :  { %vm1200_vm13 = vcmp.eq.s32.totalorder %v3185_v39, %v2225_v16  ;;  %v1260_v44 = vsel %vm1196_vm12, 1, %v2091_v13  ;;  %vm1392_vm14 = vcmp.eq.s32.totalorder %v3181_v23, %v2227_v19  ;;  %vm1396_vm15 = vcmp.eq.s32.totalorder %v3185_v39, %v2227_v19 }
 0x125   :  { %v1128_v45 = vadd.s32 %v1064_v42, %v932_v59  ;;  %v1132_v43 = vadd.s32 %v1068_v21, %v936_v41  ;;  %v1264_v46 = vsel %vm1200_vm13, 1, %v2091_v13  ;;  %v1456_v2 = vsel %vm1392_vm14, 1, %v2091_v13 }
 0x126   :  { %v1460_v27 = vsel %vm1396_vm15, 1, %v2091_v13  ;;  %vm85_vm0 = vcmp.eq.s32.totalorder %v3181_v23, %v2230_v20  ;;  %vm89_vm1 = vcmp.eq.s32.totalorder %v3185_v39, %v2230_v20  ;;  %vm217_vm2 = vcmp.eq.s32.totalorder %v3181_v23, %v2261_v33 }
 0x127   :  { %v1324_v47 = vadd.s32 %v1260_v44, %v1128_v45  ;;  %v1328_v48 = vadd.s32 %v1264_v46, %v1132_v43  ;;  %v149_v3 = vsel %vm85_vm0, 1, %v2091_v13  ;;  %v153_v51 = vsel %vm89_vm1, 1, %v2091_v13 }
 0x128   :  { %vm221_vm3 = vcmp.eq.s32.totalorder %v3185_v39, %v2261_v33  ;;  %v281_v52 = vsel %vm217_vm2, 1, %v2091_v13  ;;  %vm413_vm4 = vcmp.eq.s32.totalorder %v3181_v23, %v2264_v34  ;;  %vm417_vm5 = vcmp.eq.s32.totalorder %v3185_v39, %v2264_v34 }
 0x129   :  { %v1520_v55 = vadd.s32 %v1456_v2, %v1324_v47  ;;  %v1524_v56 = vadd.s32 %v1460_v27, %v1328_v48  ;;  %v285_v60 = vsel %vm221_vm3, 1, %v2091_v13  ;;  %v345_v61 = vadd.s32 %v281_v52, %v149_v3 }
 0x12a   :  { %v349_v62 = vadd.s32 %v285_v60, %v153_v51  ;;  %v477_v63 = vsel %vm413_vm4, 1, %v2091_v13  ;;  %v481_v4 = vsel %vm417_vm5, 1, %v2091_v13  ;;  %vm609_vm6 = vcmp.eq.s32.totalorder %v3181_v23, %v2281_v53 }
 0x12b   :  { %v1584_v17 = vcvt.s32.f32 %v1520_v55  ;;  %v1588_v22 = vcvt.s32.f32 %v1524_v56  ;;  %v541_v31 = vadd.s32 %v477_v63, %v345_v61  ;;  %vm613_vm7 = vcmp.eq.s32.totalorder %v3185_v39, %v2281_v53 }
 0x12c   :  { %v545_v32 = vadd.s32 %v481_v4, %v349_v62  ;;  %v673_v40 = vsel %vm609_vm6, 1, %v2091_v13  ;;  %v677_v59 = vsel %vm613_vm7, 1, %v2091_v13  ;;  %vm805_vm8 = vcmp.eq.s32.totalorder %v3181_v23, %v2284_v54 }
 0x12d   :  { %v1640_v41 = vpack.c.bf16 %v1588_v22, %v1584_v17  ;;  %v737_v42 = vadd.s32 %v673_v40, %v541_v31  ;;  %vm809_vm9 = vcmp.eq.s32.totalorder %v3185_v39, %v2284_v54  ;;  %v869_v21 = vsel %vm805_vm8, 1, %v2091_v13 }
 0x12e   :  { %v741_v44 = vadd.s32 %v677_v59, %v545_v32  ;;  %v873_v45 = vsel %vm809_vm9, 1, %v2091_v13  ;;  %vm1001_vm10 = vcmp.eq.s32.totalorder %v3181_v23, %v2287_v57  ;;  %vm1005_vm11 = vcmp.eq.s32.totalorder %v3185_v39, %v2287_v57 }
 0x12f   :  { %1712 = vmatpush.bf16.msra.mxu1 %v1640_v41  ;;  %v933_v43 = vadd.s32 %v869_v21, %v737_v42  ;;  %v1065_v46 = vsel %vm1001_vm10, 1, %v2091_v13  ;;  %v1069_v2 = vsel %vm1005_vm11, 1, %v2091_v13  ;;  %vm1197_vm12 = vcmp.eq.s32.totalorder %v3181_v23, %v2290_v58 }
 0x130   :  { %v937_v27 = vadd.s32 %v873_v45, %v741_v44  ;;  %vm1201_vm13 = vcmp.eq.s32.totalorder %v3185_v39, %v2290_v58  ;;  %v1261_v47 = vsel %vm1197_vm12, 1, %v2091_v13  ;;  %vm1393_vm14 = vcmp.eq.s32.totalorder %v3181_v23, %v2317_v28 }
 0x131   :  { %v1129_v48 = vadd.s32 %v1065_v46, %v933_v43  ;;  %v1265_v3 = vsel %vm1201_vm13, 1, %v2091_v13  ;;  %vm1397_vm15 = vcmp.eq.s32.totalorder %v3185_v39, %v2317_v28  ;;  %v1457_v51 = vsel %vm1393_vm14, 1, %v2091_v13 }
 0x132   :  { %v1133_v52 = vadd.s32 %v1069_v2, %v937_v27  ;;  %v1461_v55 = vsel %vm1397_vm15, 1, %v2091_v13  ;;  %vm86_vm0 = vcmp.eq.s32.totalorder %v3181_v23, %v2319_v29  ;;  %vm90_vm1 = vcmp.eq.s32.totalorder %v3185_v39, %v2319_v29 }
 0x133   :  { %v1325_v56 = vadd.s32 %v1261_v47, %v1129_v48  ;;  %v150_v60 = vsel %vm86_vm0, 1, %v2091_v13  ;;  %v154_v61 = vsel %vm90_vm1, 1, %v2091_v13  ;;  %vm218_vm2 = vcmp.eq.s32.totalorder %v3181_v23, %v2321_v30 }
 0x134   :  { %v1329_v62 = vadd.s32 %v1265_v3, %v1133_v52  ;;  %vm222_vm3 = vcmp.eq.s32.totalorder %v3185_v39, %v2321_v30  ;;  %v282_v63 = vsel %vm218_vm2, 1, %v2091_v13  ;;  %vm414_vm4 = vcmp.eq.s32.totalorder %v3181_v23, %v2323_v35 }
 0x135   :  { %v1521_v4 = vadd.s32 %v1457_v51, %v1325_v56  ;;  %v286_v17 = vsel %vm222_vm3, 1, %v2091_v13  ;;  %v346_v22 = vadd.s32 %v282_v63, %v150_v60  ;;  %vm418_vm5 = vcmp.eq.s32.totalorder %v3185_v39, %v2323_v35 }
 0x136   :  { %v1525_v31 = vadd.s32 %v1461_v55, %v1329_v62  ;;  %v350_v32 = vadd.s32 %v286_v17, %v154_v61  ;;  %v478_v40 = vsel %vm414_vm4, 1, %v2091_v13  ;;  %v482_v59 = vsel %vm418_vm5, 1, %v2091_v13 }
 0x137   :  { %v1585_v41 = vcvt.s32.f32 %v1521_v4  ;;  %v542_v42 = vadd.s32 %v478_v40, %v346_v22  ;;  %vm610_vm6 = vcmp.eq.s32.totalorder %v3181_v23, %v2325_v36  ;;  %vm614_vm7 = vcmp.eq.s32.totalorder %v3185_v39, %v2325_v36 }
 0x138   :  { %v1589_v21 = vcvt.s32.f32 %v1525_v31  ;;  %v546_v44 = vadd.s32 %v482_v59, %v350_v32  ;;  %v674_v45 = vsel %vm610_vm6, 1, %v2091_v13  ;;  %v678_v43 = vsel %vm614_vm7, 1, %v2091_v13 }
 0x139   :  { %v738_v46 = vadd.s32 %v674_v45, %v542_v42  ;;  %vm806_vm8 = vcmp.eq.s32.totalorder %v3181_v23, %v2357_v18  ;;  %vm810_vm9 = vcmp.eq.s32.totalorder %v3185_v39, %v2357_v18  ;;  %vm1002_vm10 = vcmp.eq.s32.totalorder %v3181_v23, %v2359_v24 }
 0x13a   :  { %v1641_v2 = vpack.c.bf16 %v1589_v21, %v1585_v41  ;;  %v742_v27 = vadd.s32 %v678_v43, %v546_v44  ;;  %v870_v47 = vsel %vm806_vm8, 1, %v2091_v13  ;;  %v874_v48 = vsel %vm810_vm9, 1, %v2091_v13 }
 0x13b   :  { %v934_v3 = vadd.s32 %v870_v47, %v738_v46  ;;  %vm1006_vm11 = vcmp.eq.s32.totalorder %v3185_v39, %v2359_v24  ;;  %v1066_v51 = vsel %vm1002_vm10, 1, %v2091_v13  ;;  %vm1198_vm12 = vcmp.eq.s32.totalorder %v3181_v23, %v2361_v25 }
 0x13c   :  { %1735 = vmatpush.bf16.msra.mxu2 %v1641_v2  ;;  %v938_v52 = vadd.s32 %v874_v48, %v742_v27  ;;  %v1070_v55 = vsel %vm1006_vm11, 1, %v2091_v13  ;;  %vm1202_vm13 = vcmp.eq.s32.totalorder %v3185_v39, %v2361_v25  ;;  %v1262_v56 = vsel %vm1198_vm12, 1, %v2091_v13 }
 0x13d   :  { %v1130_v60 = vadd.s32 %v1066_v51, %v934_v3  ;;  %v1266_v61 = vsel %vm1202_vm13, 1, %v2091_v13  ;;  %vm1394_vm14 = vcmp.eq.s32.totalorder %v3181_v23, %v2367_v26  ;;  %vm1398_vm15 = vcmp.eq.s32.totalorder %v3185_v39, %v2367_v26 }
 0x13e   :  { %v1134_v62 = vadd.s32 %v1070_v55, %v938_v52  ;;  %v1458_v63 = vsel %vm1394_vm14, 1, %v2091_v13  ;;  %v3379_v4 = vadd.s32 16, %v2115_v1  ;;  %v1462_v22 = vsel %vm1398_vm15, 1, %v2091_v13 }
 0x13f   :  { %v1326_v17 = vadd.s32 %v1262_v56, %v1130_v60  ;;  %v3383_v31 = vadd.s32 24, %v2115_v1 }
 0x140   :  { %v1330_v32 = vadd.s32 %v1266_v61, %v1134_v62  ;;  %vm75_vm0 = vcmp.eq.s32.totalorder %v3379_v4, %v2123_v5  ;;  %vm207_vm1 = vcmp.eq.s32.totalorder %v3379_v4, %v2125_v6  ;;  %vm403_vm2 = vcmp.eq.s32.totalorder %v3379_v4, %v2127_v7 }
 0x141   :  { %v1522_v23 = vadd.s32 %v1458_v63, %v1326_v17  ;;  %vm79_vm3 = vcmp.eq.s32.totalorder %v3383_v31, %v2123_v5  ;;  %v139_v39 = vsel %vm75_vm0, 1, %v2091_v13  ;;  %vm211_vm4 = vcmp.eq.s32.totalorder %v3383_v31, %v2125_v6 }
 0x142   :  { %v1526_v40 = vadd.s32 %v1462_v22, %v1330_v32  ;;  %v143_v59 = vsel %vm79_vm3, 1, %v2091_v13  ;;  %v271_v41 = vsel %vm207_vm1, 1, %v2091_v13  ;;  %v275_v42 = vsel %vm211_vm4, 1, %v2091_v13 }
 0x143   :  { %v1586_v21 = vcvt.s32.f32 %v1522_v23  ;;  %v335_v44 = vadd.s32 %v271_v41, %v139_v39  ;;  %v339_v45 = vadd.s32 %v275_v42, %v143_v59  ;;  %vm407_vm5 = vcmp.eq.s32.totalorder %v3383_v31, %v2127_v7 }
 0x144   :  { %v1590_v43 = vcvt.s32.f32 %v1526_v40  ;;  %v467_v46 = vsel %vm403_vm2, 1, %v2091_v13  ;;  %v471_v2 = vsel %vm407_vm5, 1, %v2091_v13  ;;  %vm599_vm6 = vcmp.eq.s32.totalorder %v3379_v4, %v2129_v8 }
 0x145   :  { %v531_v27 = vadd.s32 %v467_v46, %v335_v44  ;;  %v535_v47 = vadd.s32 %v471_v2, %v339_v45  ;;  %vm603_vm7 = vcmp.eq.s32.totalorder %v3383_v31, %v2129_v8  ;;  %v663_v48 = vsel %vm599_vm6, 1, %v2091_v13 }
 0x146   :  { %v1642_v3 = vpack.c.bf16 %v1590_v43, %v1586_v21  ;;  %v667_v51 = vsel %vm603_vm7, 1, %v2091_v13  ;;  %vm795_vm8 = vcmp.eq.s32.totalorder %v3379_v4, %v2131_v9  ;;  %vm799_vm9 = vcmp.eq.s32.totalorder %v3383_v31, %v2131_v9 }
 0x147   :  { %v727_v52 = vadd.s32 %v663_v48, %v531_v27  ;;  %v731_v55 = vadd.s32 %v667_v51, %v535_v47  ;;  %v859_v56 = vsel %vm795_vm8, 1, %v2091_v13  ;;  %v863_v60 = vsel %vm799_vm9, 1, %v2091_v13 }
 0x148   :  { %1758 = vmatpush.bf16.msra.mxu3 %v1642_v3  ;;  %vm991_vm10 = vcmp.eq.s32.totalorder %v3379_v4, %v2133_v10  ;;  %vm995_vm11 = vcmp.eq.s32.totalorder %v3383_v31, %v2133_v10  ;;  %vm1187_vm12 = vcmp.eq.s32.totalorder %v3379_v4, %v2135_v11  ;;  %vm1191_vm13 = vcmp.eq.s32.totalorder %v3383_v31, %v2135_v11 }
 0x149   :  { %v923_v61 = vadd.s32 %v859_v56, %v727_v52  ;;  %v927_v62 = vadd.s32 %v863_v60, %v731_v55  ;;  %v1055_v63 = vsel %vm991_vm10, 1, %v2091_v13  ;;  %v1059_v17 = vsel %vm995_vm11, 1, %v2091_v13 }
 0x14a   :  { %v1251_v22 = vsel %vm1187_vm12, 1, %v2091_v13  ;;  %v1255_v32 = vsel %vm1191_vm13, 1, %v2091_v13  ;;  %vm1383_vm14 = vcmp.eq.s32.totalorder %v3379_v4, %v2137_v12  ;;  %vm1387_vm15 = vcmp.eq.s32.totalorder %v3383_v31, %v2137_v12 }
 0x14b   :  { %v1119_v23 = vadd.s32 %v1055_v63, %v923_v61  ;;  %v1123_v39 = vadd.s32 %v1059_v17, %v927_v62  ;;  %v1447_v40 = vsel %vm1383_vm14, 1, %v2091_v13  ;;  %v1451_v59 = vsel %vm1387_vm15, 1, %v2091_v13 }
 0x14c   :  { %vm76_vm0 = vcmp.eq.s32.totalorder %v3379_v4, %v2185_v37  ;;  %vm80_vm1 = vcmp.eq.s32.totalorder %v3383_v31, %v2185_v37  ;;  %vm208_vm2 = vcmp.eq.s32.totalorder %v3379_v4, %v2187_v38  ;;  %vm212_vm3 = vcmp.eq.s32.totalorder %v3383_v31, %v2187_v38 }
 0x14d   :  { %v1315_v41 = vadd.s32 %v1251_v22, %v1119_v23  ;;  %v1319_v42 = vadd.s32 %v1255_v32, %v1123_v39  ;;  %v140_v21 = vsel %vm76_vm0, 1, %v2091_v13  ;;  %v144_v44 = vsel %vm80_vm1, 1, %v2091_v13 }
 0x14e   :  { %v272_v45 = vsel %vm208_vm2, 1, %v2091_v13  ;;  %v276_v43 = vsel %vm212_vm3, 1, %v2091_v13  ;;  %vm404_vm4 = vcmp.eq.s32.totalorder %v3379_v4, %v2203_v49  ;;  %vm408_vm5 = vcmp.eq.s32.totalorder %v3383_v31, %v2203_v49 }
 0x14f   :  { %v1511_v46 = vadd.s32 %v1447_v40, %v1315_v41  ;;  %v1515_v2 = vadd.s32 %v1451_v59, %v1319_v42  ;;  %v336_v27 = vadd.s32 %v272_v45, %v140_v21  ;;  %v340_v47 = vadd.s32 %v276_v43, %v144_v44 }
 0x150   :  { %v468_v48 = vsel %vm404_vm4, 1, %v2091_v13  ;;  %v472_v3 = vsel %vm408_vm5, 1, %v2091_v13  ;;  %vm600_vm6 = vcmp.eq.s32.totalorder %v3379_v4, %v2205_v50  ;;  %vm604_vm7 = vcmp.eq.s32.totalorder %v3383_v31, %v2205_v50 }
 0x151   :  { %v1575_v51 = vcvt.s32.f32 %v1511_v46  ;;  %v1579_v52 = vcvt.s32.f32 %v1515_v2  ;;  %v532_v55 = vadd.s32 %v468_v48, %v336_v27  ;;  %v536_v56 = vadd.s32 %v472_v3, %v340_v47 }
 0x152   :  { %v664_v60 = vsel %vm600_vm6, 1, %v2091_v13  ;;  %v668_v61 = vsel %vm604_vm7, 1, %v2091_v13  ;;  %vm796_vm8 = vcmp.eq.s32.totalorder %v3379_v4, %v2221_v14  ;;  %vm800_vm9 = vcmp.eq.s32.totalorder %v3383_v31, %v2221_v14 }
 0x153   :  { %v1635_v62 = vpack.c.bf16 %v1579_v52, %v1575_v51  ;;  %v728_v63 = vadd.s32 %v664_v60, %v532_v55  ;;  %v732_v17 = vadd.s32 %v668_v61, %v536_v56  ;;  %v860_v22 = vsel %vm796_vm8, 1, %v2091_v13 }
 0x154   :  { %v864_v32 = vsel %vm800_vm9, 1, %v2091_v13  ;;  %vm992_vm10 = vcmp.eq.s32.totalorder %v3379_v4, %v2223_v15  ;;  %vm996_vm11 = vcmp.eq.s32.totalorder %v3383_v31, %v2223_v15  ;;  %vm1188_vm12 = vcmp.eq.s32.totalorder %v3379_v4, %v2225_v16 }
 0x155   :  { %1690 = vmatpush.bf16.msra.mxu0 %v1635_v62  ;;  %v924_v23 = vadd.s32 %v860_v22, %v728_v63  ;;  %v928_v39 = vadd.s32 %v864_v32, %v732_v17  ;;  %v1056_v40 = vsel %vm992_vm10, 1, %v2091_v13  ;;  %v1060_v59 = vsel %vm996_vm11, 1, %v2091_v13 }
 0x156   :  { %vm1192_vm13 = vcmp.eq.s32.totalorder %v3383_v31, %v2225_v16  ;;  %v1252_v41 = vsel %vm1188_vm12, 1, %v2091_v13  ;;  %vm1384_vm14 = vcmp.eq.s32.totalorder %v3379_v4, %v2227_v19  ;;  %vm1388_vm15 = vcmp.eq.s32.totalorder %v3383_v31, %v2227_v19 }
 0x157   :  { %v1120_v42 = vadd.s32 %v1056_v40, %v924_v23  ;;  %v1124_v21 = vadd.s32 %v1060_v59, %v928_v39  ;;  %v1256_v44 = vsel %vm1192_vm13, 1, %v2091_v13  ;;  %v1448_v45 = vsel %vm1384_vm14, 1, %v2091_v13 }
 0x158   :  { %v1452_v43 = vsel %vm1388_vm15, 1, %v2091_v13  ;;  %vm77_vm0 = vcmp.eq.s32.totalorder %v3379_v4, %v2230_v20  ;;  %vm81_vm1 = vcmp.eq.s32.totalorder %v3383_v31, %v2230_v20  ;;  %vm209_vm2 = vcmp.eq.s32.totalorder %v3379_v4, %v2261_v33 }
 0x159   :  { %v1316_v46 = vadd.s32 %v1252_v41, %v1120_v42  ;;  %v1320_v2 = vadd.s32 %v1256_v44, %v1124_v21  ;;  %v141_v27 = vsel %vm77_vm0, 1, %v2091_v13  ;;  %v145_v47 = vsel %vm81_vm1, 1, %v2091_v13 }
 0x15a   :  { %vm213_vm3 = vcmp.eq.s32.totalorder %v3383_v31, %v2261_v33  ;;  %v273_v48 = vsel %vm209_vm2, 1, %v2091_v13  ;;  %vm405_vm4 = vcmp.eq.s32.totalorder %v3379_v4, %v2264_v34  ;;  %vm409_vm5 = vcmp.eq.s32.totalorder %v3383_v31, %v2264_v34 }
 0x15b   :  { %v1512_v3 = vadd.s32 %v1448_v45, %v1316_v46  ;;  %v1516_v51 = vadd.s32 %v1452_v43, %v1320_v2  ;;  %v277_v52 = vsel %vm213_vm3, 1, %v2091_v13  ;;  %v337_v55 = vadd.s32 %v273_v48, %v141_v27 }
 0x15c   :  { %v341_v56 = vadd.s32 %v277_v52, %v145_v47  ;;  %v469_v60 = vsel %vm405_vm4, 1, %v2091_v13  ;;  %v473_v61 = vsel %vm409_vm5, 1, %v2091_v13  ;;  %vm601_vm6 = vcmp.eq.s32.totalorder %v3379_v4, %v2281_v53 }
 0x15d   :  { %v1576_v62 = vcvt.s32.f32 %v1512_v3  ;;  %v1580_v63 = vcvt.s32.f32 %v1516_v51  ;;  %v533_v17 = vadd.s32 %v469_v60, %v337_v55  ;;  %vm605_vm7 = vcmp.eq.s32.totalorder %v3383_v31, %v2281_v53 }
 0x15e   :  { %v537_v22 = vadd.s32 %v473_v61, %v341_v56  ;;  %v665_v32 = vsel %vm601_vm6, 1, %v2091_v13  ;;  %v669_v23 = vsel %vm605_vm7, 1, %v2091_v13  ;;  %vm797_vm8 = vcmp.eq.s32.totalorder %v3379_v4, %v2284_v54 }
 0x15f   :  { %v1636_v39 = vpack.c.bf16 %v1580_v63, %v1576_v62  ;;  %v729_v40 = vadd.s32 %v665_v32, %v533_v17  ;;  %vm801_vm9 = vcmp.eq.s32.totalorder %v3383_v31, %v2284_v54  ;;  %v861_v59 = vsel %vm797_vm8, 1, %v2091_v13 }
 0x160   :  { %v733_v41 = vadd.s32 %v669_v23, %v537_v22  ;;  %v865_v42 = vsel %vm801_vm9, 1, %v2091_v13  ;;  %vm993_vm10 = vcmp.eq.s32.totalorder %v3379_v4, %v2287_v57  ;;  %vm997_vm11 = vcmp.eq.s32.totalorder %v3383_v31, %v2287_v57 }
 0x161   :  { %1713 = vmatpush.bf16.msra.mxu1 %v1636_v39  ;;  %v925_v21 = vadd.s32 %v861_v59, %v729_v40  ;;  %v1057_v44 = vsel %vm993_vm10, 1, %v2091_v13  ;;  %v1061_v45 = vsel %vm997_vm11, 1, %v2091_v13  ;;  %vm1189_vm12 = vcmp.eq.s32.totalorder %v3379_v4, %v2290_v58 }
 0x162   :  { %v929_v43 = vadd.s32 %v865_v42, %v733_v41  ;;  %vm1193_vm13 = vcmp.eq.s32.totalorder %v3383_v31, %v2290_v58  ;;  %v1253_v46 = vsel %vm1189_vm12, 1, %v2091_v13  ;;  %vm1385_vm14 = vcmp.eq.s32.totalorder %v3379_v4, %v2317_v28 }
 0x163   :  { %v1121_v2 = vadd.s32 %v1057_v44, %v925_v21  ;;  %v1257_v27 = vsel %vm1193_vm13, 1, %v2091_v13  ;;  %vm1389_vm15 = vcmp.eq.s32.totalorder %v3383_v31, %v2317_v28  ;;  %v1449_v47 = vsel %vm1385_vm14, 1, %v2091_v13 }
 0x164   :  { %v1125_v48 = vadd.s32 %v1061_v45, %v929_v43  ;;  %v1453_v3 = vsel %vm1389_vm15, 1, %v2091_v13  ;;  %vm78_vm0 = vcmp.eq.s32.totalorder %v3379_v4, %v2319_v29  ;;  %vm82_vm1 = vcmp.eq.s32.totalorder %v3383_v31, %v2319_v29 }
 0x165   :  { %v1317_v51 = vadd.s32 %v1253_v46, %v1121_v2  ;;  %v142_v52 = vsel %vm78_vm0, 1, %v2091_v13  ;;  %v146_v55 = vsel %vm82_vm1, 1, %v2091_v13  ;;  %vm210_vm2 = vcmp.eq.s32.totalorder %v3379_v4, %v2321_v30 }
 0x166   :  { %v1321_v56 = vadd.s32 %v1257_v27, %v1125_v48  ;;  %vm214_vm3 = vcmp.eq.s32.totalorder %v3383_v31, %v2321_v30  ;;  %v274_v60 = vsel %vm210_vm2, 1, %v2091_v13  ;;  %vm406_vm4 = vcmp.eq.s32.totalorder %v3379_v4, %v2323_v35 }
 0x167   :  { %v1513_v61 = vadd.s32 %v1449_v47, %v1317_v51  ;;  %v278_v62 = vsel %vm214_vm3, 1, %v2091_v13  ;;  %v338_v63 = vadd.s32 %v274_v60, %v142_v52  ;;  %vm410_vm5 = vcmp.eq.s32.totalorder %v3383_v31, %v2323_v35 }
 0x168   :  { %v1517_v17 = vadd.s32 %v1453_v3, %v1321_v56  ;;  %v342_v22 = vadd.s32 %v278_v62, %v146_v55  ;;  %v470_v32 = vsel %vm406_vm4, 1, %v2091_v13  ;;  %v474_v23 = vsel %vm410_vm5, 1, %v2091_v13 }
 0x169   :  { %v1577_v39 = vcvt.s32.f32 %v1513_v61  ;;  %v534_v40 = vadd.s32 %v470_v32, %v338_v63  ;;  %vm602_vm6 = vcmp.eq.s32.totalorder %v3379_v4, %v2325_v36  ;;  %vm606_vm7 = vcmp.eq.s32.totalorder %v3383_v31, %v2325_v36 }
 0x16a   :  { %v1581_v59 = vcvt.s32.f32 %v1517_v17  ;;  %v538_v41 = vadd.s32 %v474_v23, %v342_v22  ;;  %v666_v42 = vsel %vm602_vm6, 1, %v2091_v13  ;;  %v670_v21 = vsel %vm606_vm7, 1, %v2091_v13 }
 0x16b   :  { %v730_v44 = vadd.s32 %v666_v42, %v534_v40  ;;  %vm798_vm8 = vcmp.eq.s32.totalorder %v3379_v4, %v2357_v18  ;;  %vm802_vm9 = vcmp.eq.s32.totalorder %v3383_v31, %v2357_v18  ;;  %vm994_vm10 = vcmp.eq.s32.totalorder %v3379_v4, %v2359_v24 }
 0x16c   :  { %v1637_v45 = vpack.c.bf16 %v1581_v59, %v1577_v39  ;;  %v734_v43 = vadd.s32 %v670_v21, %v538_v41  ;;  %v862_v46 = vsel %vm798_vm8, 1, %v2091_v13  ;;  %v866_v2 = vsel %vm802_vm9, 1, %v2091_v13 }
 0x16d   :  { %v926_v27 = vadd.s32 %v862_v46, %v730_v44  ;;  %vm998_vm11 = vcmp.eq.s32.totalorder %v3383_v31, %v2359_v24  ;;  %v1058_v47 = vsel %vm994_vm10, 1, %v2091_v13  ;;  %vm1190_vm12 = vcmp.eq.s32.totalorder %v3379_v4, %v2361_v25 }
 0x16e   :  { %1736 = vmatpush.bf16.msra.mxu2 %v1637_v45  ;;  %v930_v48 = vadd.s32 %v866_v2, %v734_v43  ;;  %v1062_v3 = vsel %vm998_vm11, 1, %v2091_v13  ;;  %vm1194_vm13 = vcmp.eq.s32.totalorder %v3383_v31, %v2361_v25  ;;  %v1254_v51 = vsel %vm1190_vm12, 1, %v2091_v13 }
 0x16f   :  { %v1122_v52 = vadd.s32 %v1058_v47, %v926_v27  ;;  %v1258_v55 = vsel %vm1194_vm13, 1, %v2091_v13  ;;  %vm1386_vm14 = vcmp.eq.s32.totalorder %v3379_v4, %v2367_v26  ;;  %vm1390_vm15 = vcmp.eq.s32.totalorder %v3383_v31, %v2367_v26 }
 0x170   :  { %v1126_v56 = vadd.s32 %v1062_v3, %v930_v48  ;;  %v1450_v60 = vsel %vm1386_vm14, 1, %v2091_v13  ;;  %v1454_v61 = vsel %vm1390_vm15, 1, %v2091_v13  ;;  %v3578_v62 = vadd.s32 8, %v2115_v1 }
 0x171   :  { %v1318_v63 = vadd.s32 %v1254_v51, %v1122_v52  ;;  %vm67_vm0 = vcmp.eq.s32.totalorder %v2115_v1, %v2123_v5  ;;  %vm199_vm1 = vcmp.eq.s32.totalorder %v2115_v1, %v2125_v6  ;;  %vm395_vm2 = vcmp.eq.s32.totalorder %v2115_v1, %v2127_v7 }
 0x172   :  { %v1322_v4 = vadd.s32 %v1258_v55, %v1126_v56  ;;  %vm71_vm3 = vcmp.eq.s32.totalorder %v3578_v62, %v2123_v5  ;;  %v131_v31 = vsel %vm67_vm0, 1, %v2091_v13  ;;  %vm203_vm4 = vcmp.eq.s32.totalorder %v3578_v62, %v2125_v6 }
 0x173   :  { %v1514_v17 = vadd.s32 %v1450_v60, %v1318_v63  ;;  %v135_v22 = vsel %vm71_vm3, 1, %v2091_v13  ;;  %v263_v32 = vsel %vm199_vm1, 1, %v2091_v13  ;;  %v267_v23 = vsel %vm203_vm4, 1, %v2091_v13 }
 0x174   :  { %v1518_v39 = vadd.s32 %v1454_v61, %v1322_v4  ;;  %v327_v40 = vadd.s32 %v263_v32, %v131_v31  ;;  %v331_v59 = vadd.s32 %v267_v23, %v135_v22  ;;  %vm399_vm5 = vcmp.eq.s32.totalorder %v3578_v62, %v2127_v7 }
 0x175   :  { %v1578_v41 = vcvt.s32.f32 %v1514_v17  ;;  %v459_v5 = vsel %vm395_vm2, 1, %v2091_v13  ;;  %v463_v42 = vsel %vm399_vm5, 1, %v2091_v13  ;;  %vm591_vm6 = vcmp.eq.s32.totalorder %v2115_v1, %v2129_v8 }
 0x176   :  { %v1582_v6 = vcvt.s32.f32 %v1518_v39  ;;  %v523_v21 = vadd.s32 %v459_v5, %v327_v40  ;;  %v527_v44 = vadd.s32 %v463_v42, %v331_v59  ;;  %vm595_vm7 = vcmp.eq.s32.totalorder %v3578_v62, %v2129_v8 }
 0x177   :  { %v655_v45 = vsel %vm591_vm6, 1, %v2091_v13  ;;  %v659_v43 = vsel %vm595_vm7, 1, %v2091_v13  ;;  %vm787_vm8 = vcmp.eq.s32.totalorder %v2115_v1, %v2131_v9  ;;  %vm791_vm9 = vcmp.eq.s32.totalorder %v3578_v62, %v2131_v9 }
 0x178   :  { %v1638_v7 = vpack.c.bf16 %v1582_v6, %v1578_v41  ;;  %v719_v46 = vadd.s32 %v655_v45, %v523_v21  ;;  %v723_v2 = vadd.s32 %v659_v43, %v527_v44  ;;  %v851_v27 = vsel %vm787_vm8, 1, %v2091_v13 }
 0x179   :  { %v855_v47 = vsel %vm791_vm9, 1, %v2091_v13  ;;  %vm983_vm10 = vcmp.eq.s32.totalorder %v2115_v1, %v2133_v10  ;;  %vm987_vm11 = vcmp.eq.s32.totalorder %v3578_v62, %v2133_v10  ;;  %vm1179_vm12 = vcmp.eq.s32.totalorder %v2115_v1, %v2135_v11 }
 0x17a   :  { %1759 = vmatpush.bf16.msra.mxu3 %v1638_v7  ;;  %v915_v8 = vadd.s32 %v851_v27, %v719_v46  ;;  %v919_v48 = vadd.s32 %v855_v47, %v723_v2  ;;  %v1047_v9 = vsel %vm983_vm10, 1, %v2091_v13  ;;  %v1051_v3 = vsel %vm987_vm11, 1, %v2091_v13 }
 0x17b   :  { %vm1183_vm13 = vcmp.eq.s32.totalorder %v3578_v62, %v2135_v11  ;;  %v1243_v51 = vsel %vm1179_vm12, 1, %v2091_v13  ;;  %vm1375_vm14 = vcmp.eq.s32.totalorder %v2115_v1, %v2137_v12  ;;  %vm1379_vm15 = vcmp.eq.s32.totalorder %v3578_v62, %v2137_v12 }
 0x17c   :  { %v1111_v10 = vadd.s32 %v1047_v9, %v915_v8  ;;  %v1115_v52 = vadd.s32 %v1051_v3, %v919_v48  ;;  %v1247_v55 = vsel %vm1183_vm13, 1, %v2091_v13  ;;  %v1439_v56 = vsel %vm1375_vm14, 1, %v2091_v13 }
 0x17d   :  { %v1443_v60 = vsel %vm1379_vm15, 1, %v2091_v13  ;;  %vm68_vm0 = vcmp.eq.s32.totalorder %v2115_v1, %v2185_v37  ;;  %vm72_vm1 = vcmp.eq.s32.totalorder %v3578_v62, %v2185_v37  ;;  %vm200_vm2 = vcmp.eq.s32.totalorder %v2115_v1, %v2187_v38 }
 0x17e   :  { %v1307_v11 = vadd.s32 %v1243_v51, %v1111_v10  ;;  %v1311_v61 = vadd.s32 %v1247_v55, %v1115_v52  ;;  %v132_v12 = vsel %vm68_vm0, 1, %v2091_v13  ;;  %v136_v63 = vsel %vm72_vm1, 1, %v2091_v13  ;;  %v3689_v51 = vld [vmem:[#allocation5] sm:$0xff] }
 0x17f   :  { %vm204_vm3 = vcmp.eq.s32.totalorder %v3578_v62, %v2187_v38  ;;  %v264_v4 = vsel %vm200_vm2, 1, %v2091_v13  ;;  %vm396_vm4 = vcmp.eq.s32.totalorder %v2115_v1, %v2203_v49  ;;  %vm400_vm5 = vcmp.eq.s32.totalorder %v3578_v62, %v2203_v49 }
 0x180   :  { %v1503_v37 = vadd.s32 %v1439_v56, %v1307_v11  ;;  %v1507_v31 = vadd.s32 %v1443_v60, %v1311_v61  ;;  %v268_v17 = vsel %vm204_vm3, 1, %v2091_v13  ;;  %v328_v22 = vadd.s32 %v264_v4, %v132_v12 }
 0x181   :  { %v332_v32 = vadd.s32 %v268_v17, %v136_v63  ;;  %v460_v23 = vsel %vm396_vm4, 1, %v2091_v13  ;;  %v464_v39 = vsel %vm400_vm5, 1, %v2091_v13  ;;  %vm592_vm6 = vcmp.eq.s32.totalorder %v2115_v1, %v2205_v50 }
 0x182   :  { %v1567_v38 = vcvt.s32.f32 %v1503_v37  ;;  %v1571_v40 = vcvt.s32.f32 %v1507_v31  ;;  %v524_v59 = vadd.s32 %v460_v23, %v328_v22  ;;  %vm596_vm7 = vcmp.eq.s32.totalorder %v3578_v62, %v2205_v50 }
 0x183   :  { %v528_v49 = vadd.s32 %v464_v39, %v332_v32  ;;  %v656_v41 = vsel %vm592_vm6, 1, %v2091_v13  ;;  %v660_v5 = vsel %vm596_vm7, 1, %v2091_v13  ;;  %vm788_vm8 = vcmp.eq.s32.totalorder %v2115_v1, %v2221_v14 }
 0x184   :  { %v1631_v42 = vpack.c.bf16 %v1571_v40, %v1567_v38  ;;  %v720_v6 = vadd.s32 %v656_v41, %v524_v59  ;;  %vm792_vm9 = vcmp.eq.s32.totalorder %v3578_v62, %v2221_v14  ;;  %v852_v21 = vsel %vm788_vm8, 1, %v2091_v13 }
 0x185   :  { %v724_v44 = vadd.s32 %v660_v5, %v528_v49  ;;  %v856_v45 = vsel %vm792_vm9, 1, %v2091_v13  ;;  %vm984_vm10 = vcmp.eq.s32.totalorder %v2115_v1, %v2223_v15  ;;  %vm988_vm11 = vcmp.eq.s32.totalorder %v3578_v62, %v2223_v15 }
 0x186   :  { %1691 = vmatpush.bf16.msra.mxu0 %v1631_v42  ;;  %v916_v50 = vadd.s32 %v852_v21, %v720_v6  ;;  %v1048_v43 = vsel %vm984_vm10, 1, %v2091_v13  ;;  %v1052_v7 = vsel %vm988_vm11, 1, %v2091_v13  ;;  %vm1180_vm12 = vcmp.eq.s32.totalorder %v2115_v1, %v2225_v16 }
 0x187   :  { %v920_v14 = vadd.s32 %v856_v45, %v724_v44  ;;  %vm1184_vm13 = vcmp.eq.s32.totalorder %v3578_v62, %v2225_v16  ;;  %v1244_v46 = vsel %vm1180_vm12, 1, %v2091_v13  ;;  %vm1376_vm14 = vcmp.eq.s32.totalorder %v2115_v1, %v2227_v19 }
 0x188   :  { %v1112_v2 = vadd.s32 %v1048_v43, %v916_v50  ;;  %v1248_v15 = vsel %vm1184_vm13, 1, %v2091_v13  ;;  %vm1380_vm15 = vcmp.eq.s32.totalorder %v3578_v62, %v2227_v19  ;;  %v1440_v27 = vsel %vm1376_vm14, 1, %v2091_v13 }
 0x189   :  { %v1116_v47 = vadd.s32 %v1052_v7, %v920_v14  ;;  %v1444_v8 = vsel %vm1380_vm15, 1, %v2091_v13  ;;  %vm69_vm0 = vcmp.eq.s32.totalorder %v2115_v1, %v2230_v20  ;;  %vm73_vm1 = vcmp.eq.s32.totalorder %v3578_v62, %v2230_v20  ;;  %1692 = vmatmul.bf16.vlgmr.msra.gmra.mxu0 %v3689_v51  ;;  %v1986_v7 = vld [vmem:[#allocation5 + $0x8] sm:$0xff] }
 0x18a   :  { %v1308_v16 = vadd.s32 %v1244_v46, %v1112_v2  ;;  %v133_v48 = vsel %vm69_vm0, 1, %v2091_v13  ;;  %v137_v9 = vsel %vm73_vm1, 1, %v2091_v13  ;;  %vm201_vm2 = vcmp.eq.s32.totalorder %v2115_v1, %v2261_v33 }
 0x18b   :  { %v1312_v19 = vadd.s32 %v1248_v15, %v1116_v47  ;;  %vm205_vm3 = vcmp.eq.s32.totalorder %v3578_v62, %v2261_v33  ;;  %v265_v3 = vsel %vm201_vm2, 1, %v2091_v13  ;;  %vm397_vm4 = vcmp.eq.s32.totalorder %v2115_v1, %v2264_v34 }
 0x18c   :  { %v1504_v20 = vadd.s32 %v1440_v27, %v1308_v16  ;;  %v269_v10 = vsel %vm205_vm3, 1, %v2091_v13  ;;  %v329_v52 = vadd.s32 %v265_v3, %v133_v48  ;;  %vm401_vm5 = vcmp.eq.s32.totalorder %v3578_v62, %v2264_v34 }
 0x18d   :  { %v1508_v55 = vadd.s32 %v1444_v8, %v1312_v19  ;;  %v333_v56 = vadd.s32 %v269_v10, %v137_v9  ;;  %v461_v60 = vsel %vm397_vm4, 1, %v2091_v13  ;;  %v465_v33 = vsel %vm401_vm5, 1, %v2091_v13 }
 0x18e   :  { %v1568_v11 = vcvt.s32.f32 %v1504_v20  ;;  %v525_v61 = vadd.s32 %v461_v60, %v329_v52  ;;  %vm593_vm6 = vcmp.eq.s32.totalorder %v2115_v1, %v2281_v53  ;;  %vm597_vm7 = vcmp.eq.s32.totalorder %v3578_v62, %v2281_v53 }
 0x18f   :  { %v1572_v12 = vcvt.s32.f32 %v1508_v55  ;;  %v529_v63 = vadd.s32 %v465_v33, %v333_v56  ;;  %v657_v34 = vsel %vm593_vm6, 1, %v2091_v13  ;;  %v661_v4 = vsel %vm597_vm7, 1, %v2091_v13 }
 0x190   :  { %v721_v37 = vadd.s32 %v657_v34, %v525_v61  ;;  %vm789_vm8 = vcmp.eq.s32.totalorder %v2115_v1, %v2284_v54  ;;  %vm793_vm9 = vcmp.eq.s32.totalorder %v3578_v62, %v2284_v54  ;;  %vm985_vm10 = vcmp.eq.s32.totalorder %v2115_v1, %v2287_v57 }
 0x191   :  { %v1632_v31 = vpack.c.bf16 %v1572_v12, %v1568_v11  ;;  %v725_v17 = vadd.s32 %v661_v4, %v529_v63  ;;  %v853_v53 = vsel %vm789_vm8, 1, %v2091_v13  ;;  %v857_v22 = vsel %vm793_vm9, 1, %v2091_v13 }
 0x192   :  { %v917_v32 = vadd.s32 %v853_v53, %v721_v37  ;;  %vm989_vm11 = vcmp.eq.s32.totalorder %v3578_v62, %v2287_v57  ;;  %v1049_v23 = vsel %vm985_vm10, 1, %v2091_v13  ;;  %vm1181_vm12 = vcmp.eq.s32.totalorder %v2115_v1, %v2290_v58 }
 0x193   :  { %1714 = vmatpush.bf16.msra.mxu1 %v1632_v31  ;;  %v921_v54 = vadd.s32 %v857_v22, %v725_v17  ;;  %v1053_v39 = vsel %vm989_vm11, 1, %v2091_v13  ;;  %vm1185_vm13 = vcmp.eq.s32.totalorder %v3578_v62, %v2290_v58  ;;  %v1245_v38 = vsel %vm1181_vm12, 1, %v2091_v13 }
 0x194   :  { %v1113_v40 = vadd.s32 %v1049_v23, %v917_v32  ;;  %v1249_v59 = vsel %vm1185_vm13, 1, %v2091_v13  ;;  %vm1377_vm14 = vcmp.eq.s32.totalorder %v2115_v1, %v2317_v28  ;;  %vm1381_vm15 = vcmp.eq.s32.totalorder %v3578_v62, %v2317_v28 }
 0x195   :  { %v1117_v57 = vadd.s32 %v1053_v39, %v921_v54  ;;  %v1441_v49 = vsel %vm1377_vm14, 1, %v2091_v13  ;;  %v1445_v41 = vsel %vm1381_vm15, 1, %v2091_v13  ;;  %vm70_vm0 = vcmp.eq.s32.totalorder %v2115_v1, %v2319_v29 }
 0x196   :  { %v1309_v58 = vadd.s32 %v1245_v38, %v1113_v40  ;;  %vm74_vm1 = vcmp.eq.s32.totalorder %v3578_v62, %v2319_v29  ;;  %v134_v5 = vsel %vm70_vm0, 1, %v2091_v13  ;;  %vm202_vm2 = vcmp.eq.s32.totalorder %v2115_v1, %v2321_v30  ;;  %1715 = vmatmul.bf16.vlgmr.msra.gmra.mxu1 %v3689_v51 }
 0x197   :  { %v1313_v28 = vadd.s32 %v1249_v59, %v1117_v57  ;;  %v138_v42 = vsel %vm74_vm1, 1, %v2091_v13  ;;  %vm206_vm3 = vcmp.eq.s32.totalorder %v3578_v62, %v2321_v30  ;;  %v266_v6 = vsel %vm202_vm2, 1, %v2091_v13 }
 0x198   :  { %v1505_v21 = vadd.s32 %v1441_v49, %v1309_v58  ;;  %v270_v44 = vsel %vm206_vm3, 1, %v2091_v13  ;;  %v330_v45 = vadd.s32 %v266_v6, %v134_v5  ;;  %vm398_vm4 = vcmp.eq.s32.totalorder %v2115_v1, %v2323_v35 }
 0x199   :  { %v1509_v29 = vadd.s32 %v1445_v41, %v1313_v28  ;;  %v334_v50 = vadd.s32 %v270_v44, %v138_v42  ;;  %vm402_vm5 = vcmp.eq.s32.totalorder %v3578_v62, %v2323_v35  ;;  %v462_v43 = vsel %vm398_vm4, 1, %v2091_v13  ;;  %1697 = vmatmul.bf16.gmra.mxu0 %v1986_v7 }
 0x19a   :  { %v1569_v14 = vcvt.s32.f32 %v1505_v21  ;;  %v466_v30 = vsel %vm402_vm5, 1, %v2091_v13  ;;  %v526_v46 = vadd.s32 %v462_v43, %v330_v45  ;;  %vm594_vm6 = vcmp.eq.s32.totalorder %v2115_v1, %v2325_v36 }
 0x19b   :  { %v1573_v2 = vcvt.s32.f32 %v1509_v29  ;;  %v530_v15 = vadd.s32 %v466_v30, %v334_v50  ;;  %vm598_vm7 = vcmp.eq.s32.totalorder %v3578_v62, %v2325_v36  ;;  %v658_v27 = vsel %vm594_vm6, 1, %v2091_v13 }
 0x19c   :  { %v662_v47 = vsel %vm598_vm7, 1, %v2091_v13  ;;  %v722_v35 = vadd.s32 %v658_v27, %v526_v46  ;;  %vm790_vm8 = vcmp.eq.s32.totalorder %v2115_v1, %v2357_v18  ;;  %vm794_vm9 = vcmp.eq.s32.totalorder %v3578_v62, %v2357_v18 }
 0x19d   :  { %v1633_v8 = vpack.c.bf16 %v1573_v2, %v1569_v14  ;;  %v726_v16 = vadd.s32 %v662_v47, %v530_v15  ;;  %v854_v48 = vsel %vm790_vm8, 1, %v2091_v13  ;;  %v858_v9 = vsel %vm794_vm9, 1, %v2091_v13 }
 0x19e   :  { %v918_v19 = vadd.s32 %v854_v48, %v722_v35  ;;  %vm986_vm10 = vcmp.eq.s32.totalorder %v2115_v1, %v2359_v24  ;;  %vm990_vm11 = vcmp.eq.s32.totalorder %v3578_v62, %v2359_v24  ;;  %vm1182_vm12 = vcmp.eq.s32.totalorder %v2115_v1, %v2361_v25 }
 0x19f   :  { %1737 = vmatpush.bf16.msra.mxu2 %v1633_v8  ;;  %v922_v36 = vadd.s32 %v858_v9, %v726_v16  ;;  %v1050_v18 = vsel %vm986_vm10, 1, %v2091_v13  ;;  %v1054_v3 = vsel %vm990_vm11, 1, %v2091_v13  ;;  %vm1186_vm13 = vcmp.eq.s32.totalorder %v3578_v62, %v2361_v25  ;;  %v1667_v25 = vld [vmem:[#allocation5 + $0x10] sm:$0xf] }
 0x1a0   :  { %v1114_v20 = vadd.s32 %v1050_v18, %v918_v19  ;;  %v1246_v10 = vsel %vm1182_vm12, 1, %v2091_v13  ;;  %v1250_v52 = vsel %vm1186_vm13, 1, %v2091_v13  ;;  %vm1378_vm14 = vcmp.eq.s32.totalorder %v2115_v1, %v2367_v26 }
 0x1a1   :  { %v1118_v24 = vadd.s32 %v1054_v3, %v922_v36  ;;  %vm1382_vm15 = vcmp.eq.s32.totalorder %v3578_v62, %v2367_v26  ;;  %v1442_v55 = vsel %vm1378_vm14, 1, %v2091_v13  ;;  %v1677_v12 = vunpack.c.l.b16 %v1667_v25 }
 0x1a2   :  { %v1310_v56 = vadd.s32 %v1246_v10, %v1114_v20  ;;  %v1446_v60 = vsel %vm1382_vm15, 1, %v2091_v13  ;;  %1738 = vmatmul.bf16.vlgmr.msra.gmra.mxu2 %v3689_v51  ;;  %vm1943_vm15 = vcmask 1040384  }
 0x1a3   :  { %v1314_v33 = vadd.s32 %v1250_v52, %v1118_v24  ;;  %v1680_v4 = vpack.c.b16 %v1677_v12, %v1677_v12 }
 0x1a4   :  { %v1506_v11 = vadd.s32 %v1442_v55, %v1310_v56 }
 0x1a5   :  { %v1510_v61 = vadd.s32 %v1446_v60, %v1314_v33 }
 0x1a6   :  { %v1570_v63 = vcvt.s32.f32 %v1506_v11  ;;  %1720 = vmatmul.bf16.gmra.mxu1 %v1986_v7 }
 0x1a7   :  { %v1574_v34 = vcvt.s32.f32 %v1510_v61 }
 0x1a9   :  { %v1634_v1 = vpack.c.bf16 %v1574_v34, %v1570_v63  ;;  %1702 = vmatmul.bf16.gmra.mxu0 %v1680_v4 }
 0x1ab   :  { %1760 = vmatpush.bf16.msra.mxu3 %v1634_v1 }
 0x1ae   :  { %1761 = vmatmul.bf16.vlgmr.msra.gmra.mxu3 %v3689_v51 }
 0x1b2   :  { %1743 = vmatmul.bf16.gmra.mxu2 %v1986_v7 }
 0x1b6   :  { %1725 = vmatmul.bf16.gmra.mxu1 %v1680_v4 }
 0x1be   :  { %1766 = vmatmul.bf16.gmra.mxu3 %v1986_v7 }
 0x1c2   :  { %1748 = vmatmul.bf16.gmra.mxu2 %v1680_v4 }
 0x1ce   :  { %1771 = vmatmul.bf16.gmra.mxu3 %v1680_v4 }
 0x206   :  { %v1693_v13 = vpop.f32.mrf.mxu0 }
 0x207   :  { %v1776_v22 = vmul.f32 %v1693_v13, %v1693_v13 }
 0x20e   :  { %v1695_v26 = vpop.f32.mrf.mxu0 }
 0x20f   :  { %v1780_v23 = vmul.f32 %v1695_v26, %v1695_v26 }
 0x211   :  { %v1792_v51 = vadd.f32 %v1780_v23, %v1776_v22 }
 0x213   :  { %v1716_v62 = vpop.f32.mrf.mxu1 }
 0x214   :  { %v1777_v38 = vmul.f32 %v1716_v62, %v1716_v62 }
 0x216   :  { %v1698_v31 = vpop.f32.mrf.mxu0 }
 0x217   :  { %v1784_v39 = vmul.f32 %v1698_v31, %v1698_v31 }
 0x219   :  { %v1793_v49 = vadd.f32 %v1792_v51, %v1784_v39 }
 0x21b   :  { %v1718_v37 = vpop.f32.mrf.mxu1 }
 0x21c   :  { %v1781_v54 = vmul.f32 %v1718_v37, %v1718_v37 }
 0x21e   :  { %v1700_v53 = vpop.f32.mrf.mxu0  ;;  %v1801_v57 = vadd.f32 %v1781_v54, %v1777_v38 }
 0x21f   :  { %v1788_v59 = vmul.f32 %v1700_v53, %v1700_v53 }
 0x221   :  { %v1794_v6 = vadd.f32 %v1793_v49, %v1788_v59 }
 0x223   :  { %v1721_v17 = vpop.f32.mrf.mxu1  ;;  %v1795_v29 = vrot.slane %v1794_v6, 4 }
 0x224   :  { %v1785_v40 = vmul.f32 %v1721_v17, %v1721_v17 }
 0x225   :  { %v1739_v32 = vpop.f32.mrf.mxu2  ;;  %v1796_v15 = vadd.f32 %v1795_v29, %v1794_v6 }
 0x226   :  { %v1703_v58 = vpop.f32.mrf.mxu0  ;;  %v1802_v5 = vadd.f32 %v1801_v57, %v1785_v40  ;;  %v1778_v19 = vmul.f32 %v1739_v32, %v1739_v32 }
 0x227   :  { %v1832_v43 = vrot.slane %v1703_v58, 4  ;;  %v1797_v9 = vrot.slane %v1796_v15, 2 }
 0x229   :  { %v1833_v35 = vadd.f32 %v1832_v43, %v1703_v58  ;;  %v1798_v24 = vadd.f32 %v1797_v9, %v1796_v15 }
 0x22b   :  { %v1723_v41 = vpop.f32.mrf.mxu1  ;;  %v1834_v20 = vrot.slane %v1833_v35, 2  ;;  %v1799_v63 = vrot.slane %v1798_v24, 1 }
 0x22c   :  { %v1789_v28 = vmul.f32 %v1723_v41, %v1723_v41 }
 0x22d   :  { %v1741_v42 = vpop.f32.mrf.mxu2  ;;  %v1835_v11 = vadd.f32 %v1834_v20, %v1833_v35  ;;  %v1800_v37 = vadd.f32 %v1799_v63, %v1798_v24 }
 0x22e   :  { %v1803_v21 = vadd.f32 %v1802_v5, %v1789_v28  ;;  %v1705_v14 = vpop.f32.mrf.mxu0  ;;  %v1782_v8 = vmul.f32 %v1741_v42, %v1741_v42 }
 0x22f   :  { %v1836_v13 = vrot.slane %v1835_v11, 1  ;;  %v1828_v51 = vmul.f32 0.5, %v1800_v37 }
 0x230   :  { %v1804_v44 = vrot.slane %v1803_v21, 4  ;;  %v1810_v52 = vadd.f32 %v1782_v8, %v1778_v19 }
 0x231   :  { %v1762_v45 = vpop.f32.mrf.mxu3  ;;  %v1837_v54 = vadd.f32 %v1836_v13, %v1835_v11 }
 0x232   :  { %v1805_v50 = vadd.f32 %v1804_v44, %v1803_v21  ;;  %v1779_v53 = vmul.f32 %v1762_v45, %v1762_v45 }
 0x233   :  { %v1726_v7 = vpop.f32.mrf.mxu1  ;;  %v1856_v28 = vadd.f32 %v1837_v54, %v1828_v51 }
 0x234   :  { %v1806_v30 = vrot.slane %v1805_v50, 2  ;;  %v1838_v46 = vrot.slane %v1726_v7, 4 }
 0x235   :  { %v1744_v2 = vpop.f32.mrf.mxu2 }
 0x236   :  { %v1839_v27 = vadd.f32 %v1838_v46, %v1726_v7  ;;  %v1807_v47 = vadd.f32 %v1806_v30, %v1805_v50  ;;  %v1786_v36 = vmul.f32 %v1744_v2, %v1744_v2  ;;  %v1981_v50 = vmul.f32 -1.442695, %v1856_v28 }
 0x238   :  { %v1840_v16 = vrot.slane %v1839_v27, 2  ;;  %v1808_v3 = vrot.slane %v1807_v47, 1  ;;  %v1811_v60 = vadd.f32 %v1810_v52, %v1786_v36 }
 0x239   :  { %v1764_v48 = vpop.f32.mrf.mxu3 }
 0x23a   :  { %v1841_v18 = vadd.f32 %v1840_v16, %v1839_v27  ;;  %v1809_v33 = vadd.f32 %v1808_v3, %v1807_v47  ;;  %v1783_v26 = vmul.f32 %v1764_v48, %v1764_v48 }
 0x23b   :  { %v1728_v10 = vpop.f32.mrf.mxu1 }
 0x23c   :  { %v1842_v56 = vrot.slane %v1841_v18, 1  ;;  %v1829_v4 = vmul.f32 0.5, %v1809_v33  ;;  %v1819_v39 = vadd.f32 %v1783_v26, %v1779_v53 }
 0x23d   :  { %v1746_v55 = vpop.f32.mrf.mxu2 }
 0x23e   :  { %v1790_v25 = vmul.f32 %v1746_v55, %v1746_v55  ;;  %v1843_v34 = vadd.f32 %v1842_v56, %v1841_v18 }
 0x240   :  { %v1812_v61 = vadd.f32 %v1811_v60, %v1790_v25  ;;  %v1857_v31 = vadd.f32 %v1843_v34, %v1829_v4 }
 0x241   :  { %v1767_v12 = vpop.f32.mrf.mxu3 }
 0x242   :  { %v1813_v1 = vrot.slane %v1812_v61, 4  ;;  %v1787_v22 = vmul.f32 %v1767_v12, %v1767_v12  ;;  %v1982_v57 = vmul.f32 -1.442695, %v1857_v31 }
 0x244   :  { %v1814_v62 = vadd.f32 %v1813_v1, %v1812_v61  ;;  %v1820_v49 = vadd.f32 %v1819_v39, %v1787_v22  ;;  %1993 = vpow2.f32 %v1982_v57 }
 0x245   :  { %v1749_v17 = vpop.f32.mrf.mxu2  ;;  %1995 = vpow2.f32 %v1981_v50 }
 0x246   :  { %v1815_v32 = vrot.slane %v1814_v62, 2  ;;  %v1844_v23 = vrot.slane %v1749_v17, 4 }
 0x248   :  { %v1816_v38 = vadd.f32 %v1815_v32, %v1814_v62  ;;  %v1845_v40 = vadd.f32 %v1844_v23, %v1749_v17 }
 0x249   :  { %v1769_v59 = vpop.f32.mrf.mxu3 }
 0x24a   :  { %v1817_v41 = vrot.slane %v1816_v38, 1  ;;  %v1791_v58 = vmul.f32 %v1769_v59, %v1769_v59  ;;  %v1846_v5 = vrot.slane %v1845_v40, 2  ;;  %v1994_v27 = vpop.eup %1993 }
 0x24b   :  { %v1873_v9 = vadd.f32 1.0, %v1994_v27  ;;  %v1996_v18 = vpop.eup %1995 }
 0x24c   :  { %v1818_v42 = vadd.f32 %v1817_v41, %v1816_v38  ;;  %v1821_v6 = vadd.f32 %v1820_v49, %v1791_v58  ;;  %v1847_v21 = vadd.f32 %v1846_v5, %v1845_v40  ;;  %v3778_v24 = vadd.f32 1.0, %v1996_v18 }
 0x24d   :  { %v1751_v44 = vpop.f32.mrf.mxu2  ;;  %v1900_v53 = vand.u32 2147483647, %v1873_v9  ;;  %vm1896_vm2 = vweird.f32 %v1873_v9  ;;  %v1902_v54 = vand.u32 2147483648, %v1873_v9 }
 0x24e   :  { %v1822_v45 = vrot.slane %v1821_v6, 4  ;;  %v1848_v29 = vrot.slane %v1847_v21, 1  ;;  %v1830_v43 = vmul.f32 0.5, %v1818_v42  ;;  %vm1881_vm10 = vweird.f32 %v3778_v24 }
 0x24f   :  { %vm1901_vm7 = vcmp.eq.f32.partialorder %v1900_v53, 8.507059e+37  ;;  %v1903_v5 = vor.u32 1.1754944e-38, %v1902_v54  ;;  %v1887_v44 = vand.u32 2147483648, %v3778_v24 }
 0x250   :  { %v1823_v7 = vadd.f32 %v1822_v45, %v1821_v6  ;;  %v1849_v14 = vadd.f32 %v1848_v29, %v1847_v21 }
 0x251   :  { %v1772_v30 = vpop.f32.mrf.mxu3  ;;  %v1888_v27 = vor.u32 1.1754944e-38, %v1887_v44 }
 0x252   :  { %v1824_v46 = vrot.slane %v1823_v7, 2  ;;  %v1858_v2 = vadd.f32 %v1849_v14, %v1830_v43  ;;  %v1850_v15 = vrot.slane %v1772_v30, 4  ;;  %v1885_v43 = vand.u32 2147483647, %v3778_v24 }
 0x254   :  { %v1825_v47 = vadd.f32 %v1824_v46, %v1823_v7  ;;  %v1983_v35 = vmul.f32 -1.442695, %v1858_v2  ;;  %v1851_v8 = vadd.f32 %v1850_v15, %v1772_v30 }
 0x256   :  { %v1826_v16 = vrot.slane %v1825_v47, 1  ;;  %1997 = vpow2.f32 %v1983_v35  ;;  %v1852_v48 = vrot.slane %v1851_v8, 2 }
 0x257   :  { %1999 = vrcp.f32 %v1873_v9 }
 0x258   :  { %v1827_v19 = vadd.f32 %v1826_v16, %v1825_v47  ;;  %v1853_v36 = vadd.f32 %v1852_v48, %v1851_v8 }
 0x259   :  { %v1774_v3 = vpop.f32.mrf.mxu3 }
 0x25a   :  { %v1854_v20 = vrot.slane %v1853_v36, 1  ;;  %v1831_v52 = vmul.f32 0.5, %v1827_v19 }
 0x25c   :  { %v1998_v10 = vpop.eup %1997  ;;  %v1855_v55 = vadd.f32 %v1854_v20, %v1853_v36 }
 0x25d   :  { %v1874_v56 = vadd.f32 1.0, %v1998_v10  ;;  %v2000_v33 = vpop.eup %1999 }
 0x25e   :  { %v1859_v60 = vadd.f32 %v1855_v55, %v1831_v52  ;;  %v1892_v11 = vmul.f32 %v2000_v33, %v1873_v9  ;;  %vm1897_vm0 = vweird.f32 %v2000_v33 }
 0x25f   :  { %2001 = vrcp.f32 %v1874_v56  ;;  %v1917_v39 = vand.u32 2147483648, %v1874_v56  ;;  %vm3786_vm3 = vmor %vm1896_vm2, %vm1897_vm0  ;;  %vm1911_vm4 = vweird.f32 %v1874_v56  ;;  %v1915_v51 = vand.u32 2147483647, %v1874_v56 }
 0x260   :  { %2003 = vrcp.f32 %v3778_v24  ;;  %v1984_v25 = vmul.f32 -1.442695, %v1859_v60  ;;  %v1893_v1 = vsub.f32 1.0, %v1892_v11  ;;  %vm1945_vm0 = vcmask 1042434  }
 0x261   :  { %v1918_v28 = vor.u32 1.1754944e-38, %v1917_v39  ;;  %vm1916_vm8 = vcmp.eq.f32.partialorder %v1915_v51, 8.507059e+37  ;;  %vm1947_vm2 = vcmask 1041408  }
 0x262   :  { %2005 = vpow2.f32 %v1984_v25  ;;  %v1894_v62 = vmul.f32 %v2000_v33, %v1893_v1 }
 0x264   :  { %v1895_v17 = vadd.f32 %v2000_v33, %v1894_v62 }
 0x265   :  { %v2002_v61 = vpop.eup %2001 }
 0x266   :  { %v3781_v12 = vpop.eup %2003  ;;  %v1907_v63 = vmul.f32 %v2002_v61, %v1874_v56  ;;  %vm1912_vm1 = vweird.f32 %v2002_v61  ;;  %v1899_v57 = vsel %vm3786_vm3, %v2000_v33, %v1895_v17  ;;  %vm1952_vm3 = vcmp.lt.s32.totalorder %v46_v0, 512 }
 0x267   :  { %v1877_v26 = vmul.f32 %v3781_v12, %v3778_v24  ;;  %vm1882_vm5 = vweird.f32 %v3781_v12  ;;  %vm3791_vm6 = vmor %vm1911_vm4, %vm1912_vm1  ;;  %v1904_v45 = vsel %vm1901_vm7, %v1903_v5, %v1899_v57  ;;  %vm1886_vm1 = vcmp.eq.f32.partialorder %v1885_v43, 8.507059e+37 }
 0x268   :  { %v2006_v34 = vpop.eup %2005  ;;  %v1908_v4 = vsub.f32 1.0, %v1907_v63  ;;  %vm3804_vm11 = vmor %vm1881_vm10, %vm1882_vm5  ;;  %v1940_v2 = vrot.slane %v1904_v45, 7 }
 0x269   :  { %v1875_v13 = vadd.f32 1.0, %v2006_v34  ;;  %v1878_v31 = vsub.f32 1.0, %v1877_v26 }
 0x26a   :  { %v1909_v37 = vmul.f32 %v2002_v61, %v1908_v4 }
 0x26b   :  { %2007 = vrcp.f32 %v1875_v13  ;;  %v1879_v23 = vmul.f32 %v3781_v12, %v1878_v31  ;;  %v1932_v42 = vand.u32 2147483648, %v1875_v13  ;;  %v1930_v21 = vand.u32 2147483647, %v1875_v13 }
 0x26c   :  { %v1910_v22 = vadd.f32 %v2002_v61, %v1909_v37  ;;  %vm1926_vm12 = vweird.f32 %v1875_v13 }
 0x26d   :  { %v1880_v58 = vadd.f32 %v3781_v12, %v1879_v23  ;;  %v1933_v30 = vor.u32 1.1754944e-38, %v1932_v42  ;;  %vm1931_vm14 = vcmp.eq.f32.partialorder %v1930_v21, 8.507059e+37 }
 0x26e   :  { %v1914_v49 = vsel %vm3791_vm6, %v2002_v61, %v1910_v22 }
 0x26f   :  { %v1919_v29 = vsel %vm1916_vm8, %v1918_v28, %v1914_v49  ;;  %v1884_v14 = vsel %vm3804_vm11, %v3781_v12, %v1880_v58 }
 0x270   :  { %v1941_v15 = vrot.slane %v1919_v29, 6  ;;  %v1889_v8 = vsel %vm1886_vm1, %v1888_v27, %v1884_v14 }
 0x271   :  { %v2008_v32 = vpop.eup %2007  ;;  %v1944_v16 = vsel %vm1943_vm15, %v1889_v8, %v1940_v2 }
 0x272   :  { %v1922_v38 = vmul.f32 %v2008_v32, %v1875_v13  ;;  %vm1927_vm9 = vweird.f32 %v2008_v32 }
 0x273   :  { %vm1928_vm13 = vmor %vm1926_vm12, %vm1927_vm9 }
 0x274   :  { %v1923_v41 = vsub.f32 1.0, %v1922_v38 }
 0x276   :  { %v1924_v6 = vmul.f32 %v2008_v32, %v1923_v41 }
 0x278   :  { %v1925_v7 = vadd.f32 %v2008_v32, %v1924_v6 }
 0x27a   :  { %v1929_v46 = vsel %vm1928_vm13, %v2008_v32, %v1925_v7 }
 0x27b   :  { %v1934_v47 = vsel %vm1931_vm14, %v1933_v30, %v1929_v46 }
 0x27c   :  { %v1942_v35 = vrot.slane %v1934_v47, 5 }
 0x27e   :  { %v1946_v48 = vsel %vm1945_vm0, %v1941_v15, %v1942_v35 }
 0x27f   :  { %v1948_v9 = vsel %vm1947_vm2, %v1944_v16, %v1946_v48 }
 0x280   :  { %1954 = vst.msk [vmem:[#allocation7] sm:$0xf] %vm1952_vm3, %v1948_v9 }
 0x281   :  { %1965 = dma.vmem_to_hbm [thread:$0]  %s1961_s1, 64, %s1963_s23, [#allocation4]  }
 0x282   :  { %2085 = dma.done.wait [#allocation4], 64  }
 0x283   :  { %2086 = vsyncadd [#allocation4], 4294967232 }
 0x284   :  { %1970 = vsyncpa [#allocation3], 1 }
 0x285   :  { %1971 = vsyncpa [#allocation6], 1 }
 0x286   :  { %1972 = vsyncpa [#allocation4], 1 }

</bundles_post_ra>
